<compile_context>
chip_gen: v7x
topology: tpu7x:2x2x1
jax: 0.10.0
libtpu: 0.0.40
codegen_flags: <defaults>
</compile_context>

<pallas_src>
import numpy as np
import jax
import jax.numpy as jnp
from jax.experimental import pallas as pl
from jax.experimental.pallas import tpu as pltpu

# ----------------------------- static configuration -----------------------------
B          = 2
N_MEL      = 16          # mel channels (real model: 100)
DIM        = 32          # vocos hidden dim
INTER      = 64          # ConvNeXt intermediate dim
KSIZE      = 7           # conv kernel size
PAD_CONV   = KSIZE // 2
NFFT       = 16
HOP        = 4
NFREQ      = NFFT // 2 + 1
T_TOTAL    = 24
REF_LEN    = 8           # ref_signal_len value used at trace time
T          = T_TOTAL - REF_LEN          # frames entering the vocoder
PAD_STFT   = NFFT // 2
L_OUT      = (T - 1) * HOP              # torch.istft(center=True) output length
TARGET_RMS = 0.1

BT     = B * T            # batch fused into the sublane axis (32 rows)
BLK    = 32               # lane width of one frame slot in the fused-ISTFT operand
IM_OFF = 16               # imag-part lane offset inside a frame slot
NEXP   = T * BLK          # 512 -- contraction width of the fused ISTFT matmul
L_PAD  = 128              # lane-dense padded signal length (true length L_OUT = 60)
VROW_W = 128              # packed small-vector row width

# packed small-vector row indices (w_dw taps occupy rows R_WDW .. R_WDW+KSIZE-1)
(R_B_EMB, R_G0, R_BT0, R_B_DW, R_G1, R_BT1, R_B_P1, R_B_P2,
 R_GAM, R_G2, R_BT2, R_B_MAG, R_B_PH, R_WDW) = range(14)
N_VROWS = R_WDW + KSIZE

# TODO(synk): `denoised[:, ref_signal_len:, :]` has a data-dependent output length; under JIT the
# length must be static, so ref_signal_len is treated as a static slice of length T here.


# ----------------------------- constant tables (glue, numpy) -----------------------------
def _build_static_tables():
    n = np.arange(NFFT)
    f = np.arange(NFREQ)
    ang = 2.0 * np.pi * np.outer(f, n) / NFFT
    scale = np.ones(NFREQ)
    scale[1:NFFT // 2] = 2.0                               # hermitian doubling (not DC/Nyquist)
    cb = scale[:, None] * np.cos(ang) / NFFT               # (NFREQ, NFFT)
    sb = -scale[:, None] * np.sin(ang) / NFFT
    win = 0.5 * (1.0 - np.cos(2.0 * np.pi * np.arange(NFFT) / NFFT))
    # overlap-add with window-envelope normalization and center-trim folded in
    l_full = (T - 1) * HOP + NFFT
    env = np.zeros(l_full)
    for t in range(T):
        env[t * HOP: t * HOP + NFFT] += win ** 2
    env = np.maximum(env, 1e-11)
    oa = np.zeros((T, NFFT, L_OUT))
    for t in range(T):
        for j in range(NFFT):
            g = t * HOP + j
            nn = g - PAD_STFT
            if 0 <= nn < L_OUT:
                oa[t, j, nn] = 1.0 / env[g]
    # fold window + inverse-rFFT + overlap-add into one operator per real/imag part
    m_r = np.einsum('fj,tjn->tfn', cb * win[None, :], oa)  # (T, NFREQ, L_OUT)
    m_i = np.einsum('fj,tjn->tfn', sb * win[None, :], oa)
    m_flat = np.zeros((NEXP, L_PAD), np.float32)
    tr = np.zeros((NFREQ, NEXP), np.float32)               # places real[f] at lane t*BLK+f
    ti = np.zeros((NFREQ, NEXP), np.float32)               # places imag[f] at lane t*BLK+IM_OFF+f
    for t in range(T):
        base = t * BLK
        for fq in range(NFREQ):
            tr[fq, base + fq] = 1.0
            ti[fq, base + IM_OFF + fq] = 1.0
            m_flat[base + fq, :L_OUT] = m_r[t, fq]
            m_flat[base + IM_OFF + fq, :L_OUT] = m_i[t, fq]
    # batch-aware depthwise-conv shift stack (zero padding at frame boundaries baked in)
    ss = np.zeros((KSIZE * BT, BT), np.float32)
    for k in range(KSIZE):
        off = k - PAD_CONV
        for b in range(B):
            for t in range(T):
                tt = t + off
                if 0 <= tt < T:
                    ss[k * BT + b * T + t, b * T + tt] = 1.0
    return ss, np.stack([tr, ti], axis=0).astype(np.float32), m_flat


SS_NP, TRTI_NP, MFLAT_NP = _build_static_tables()


# ----------------------------- Pallas kernel -----------------------------
def _ln(h, g, b, eps=1e-6):
    mu = jnp.mean(h, axis=-1, keepdims=True)
    d = h - mu
    var = jnp.mean(d * d, axis=-1, keepdims=True)
    return d * jax.lax.rsqrt(var + eps) * g + b


def decode_kernel(xcol_ref, w_emb_ref, ss_ref, vecs_ref, w_p1_ref, w_p2_ref,
                  w_mp_ref, trti_ref, m_ref, out_ref):
    f32 = jnp.float32

    def vec(row, width):
        return vecs_ref[row:row + 1, :width]                 # (1, width) broadcast row

    # --- vocos backbone: embed Conv1d(n_mel -> dim, k=7, pad=3) as ONE im2col matmul ---
    h = (jnp.dot(xcol_ref[...], w_emb_ref[...], preferred_element_type=f32)
         + vec(R_B_EMB, DIM))
    h = _ln(h, vec(R_G0, DIM), vec(R_BT0, DIM))

    # --- ConvNeXt block: dwconv -> LN -> pw linear -> GELU -> pw linear -> scale + residual ---
    res = h
    # depthwise conv: one matmul with a constant 0/1 shift stack gives all KSIZE batch-aware
    # shifted copies of h at 8-aligned row offsets; then per-tap scale + accumulate.
    stk = jnp.dot(ss_ref[...], h, preferred_element_type=f32)          # (KSIZE*BT, DIM)
    acc = jnp.zeros((BT, DIM), f32)
    for k in range(KSIZE):
        acc = acc + stk[k * BT:(k + 1) * BT, :] * vec(R_WDW + k, DIM)
    h = acc + vec(R_B_DW, DIM)
    h = _ln(h, vec(R_G1, DIM), vec(R_BT1, DIM))
    h = jnp.dot(h, w_p1_ref[...], preferred_element_type=f32) + vec(R_B_P1, INTER)
    # TODO(synk): vocos uses exact (erf) GELU; tanh approximation kept for TPU-safe lowering.
    h = jax.nn.gelu(h, approximate=True)
    h = jnp.dot(h, w_p2_ref[...], preferred_element_type=f32) + vec(R_B_P2, DIM)
    h = res + vec(R_GAM, DIM) * h
    h = _ln(h, vec(R_G2, DIM), vec(R_BT2, DIM))

    # --- ISTFT head: log-magnitude / phase projections -> complex spectrum ---
    s_mag = (jnp.dot(h, w_mp_ref[0:DIM, :], preferred_element_type=f32)
             + vec(R_B_MAG, NFREQ))
    phase = (jnp.dot(h, w_mp_ref[DIM:2 * DIM, :], preferred_element_type=f32)
             + vec(R_B_PH, NFREQ))
    mag = jnp.minimum(jnp.exp(s_mag), 1e2)                   # clip(exp(mag), max=1e2) as in vocos
    real = mag * jnp.cos(phase)                              # (BT, NFREQ)
    imag = mag * jnp.sin(phase)

    # --- fused ISTFT: irFFT + window + overlap-add + env-norm + center-trim == one matmul ---
    # 1) replicate (real, imag) of every row into all T frame slots (constant 0/1 placement dots)
    rep = (jnp.dot(real, trti_ref[0], preferred_element_type=f32)
           + jnp.dot(imag, trti_ref[1], preferred_element_type=f32))          # (BT, NEXP)
    # 2) keep only the slot that matches this row's own frame index t = row mod T
    r_idx = jax.lax.broadcasted_iota(jnp.int32, (BT, NEXP), 0)
    c_idx = jax.lax.broadcasted_iota(jnp.int32, (BT, NEXP), 1)
    lo = (r_idx & (T - 1)) * BLK
    ri_exp = jnp.where((c_idx >= lo) & (c_idx < lo + BLK), rep, 0.0)
    # 3) collapse the T frame rows of each batch (== flatten to (B, T*BLK)) via a 0/1 selector dot
    b_idx = jax.lax.broadcasted_iota(jnp.int32, (B, BT), 0)
    rr_idx = jax.lax.broadcasted_iota(jnp.int32, (B, BT), 1)
    sel = jnp.where((rr_idx >= b_idx * T) & (rr_idx < (b_idx + 1) * T),
                    1.0, 0.0).astype(f32)
    rib = jnp.dot(sel, ri_exp, preferred_element_type=f32)                    # (B, NEXP)
    # 4) single fused ISTFT matmul -> lane-dense (B, 128) signal (lanes >= L_OUT are zero)
    out_ref[...] = jnp.dot(rib, m_ref[...], preferred_element_type=f32)


# ----------------------------- wrapper -----------------------------
def _row(v):
    v = jnp.asarray(v, jnp.float32).reshape(1, -1)
    return jnp.pad(v, ((0, 0), (0, VROW_W - v.shape[1])))


def _pack_vecs(p):
    rows = [_row(p["b_emb"]), _row(p["g0"]), _row(p["bt0"]), _row(p["b_dw"]),
            _row(p["g1"]), _row(p["bt1"]), _row(p["b_p1"]), _row(p["b_p2"]),
            _row(p["gam"]), _row(p["g2"]), _row(p["bt2"]),
            _row(p["b_mag"]), _row(p["b_ph"])]
    rows += [_row(p["w_dw"][k]) for k in range(KSIZE)]
    return jnp.concatenate(rows, axis=0)                     # (N_VROWS, 128)


def f5_decode(denoised, ref_signal_len, params):
    # slice off the reference prompt; keep channel-last layout and build the im2col operand
    x = jax.lax.dynamic_slice_in_dim(denoised, ref_signal_len, T, axis=1)     # (B, T, N_MEL)
    xp = jnp.pad(x, ((0, 0), (PAD_CONV, PAD_CONV), (0, 0)))                   # (B, T+6, N_MEL)
    xcol = jnp.concatenate([xp[:, k:k + T, :] for k in range(KSIZE)], axis=-1)
    xcol = xcol.reshape(BT, KSIZE * N_MEL)                                    # (32, 112)

    w_emb_flat = params["w_emb"].reshape(KSIZE * N_MEL, DIM)                  # (112, 32)
    w_mp = jnp.concatenate([params["w_mag"], params["w_ph"]], axis=0)         # (64, NFREQ)
    vecs = _pack_vecs(params)

    out_pad = pl.pallas_call(
        decode_kernel,
        out_shape=jax.ShapeDtypeStruct((B, L_PAD), jnp.float32),
        in_specs=[pl.BlockSpec(memory_space=pltpu.MemorySpace.VMEM)] * 9,
        out_specs=pl.BlockSpec(memory_space=pltpu.MemorySpace.VMEM),
    )(xcol, w_emb_flat, jnp.asarray(SS_NP), vecs,
      params["w_p1"], params["w_p2"], w_mp,
      jnp.asarray(TRTI_NP), jnp.asarray(MFLAT_NP))

    # RMS normalize / scale / clamp / int16 cast: 480 bytes of elementwise glue, left to XLA
    sig = out_pad[:, :L_OUT]                                                  # (B, 60)
    mean_sq = jnp.mean(jnp.square(sig))
    scale = jnp.float32(TARGET_RMS) / jnp.sqrt(mean_sq)
    y = jnp.clip(sig * scale * 32768.0, -32768.0, 32767.0)
    # torch .to(int16) truncates toward zero; astype matches
    return y.astype(jnp.int16)                                                # (B, L_OUT)


# ----------------------------- deterministic synthetic parameters -----------------------------
def make_params():
    keys = jax.random.split(jax.random.PRNGKey(0), 8)
    f32 = jnp.float32
    return {
        "w_emb": 0.1 * jax.random.normal(keys[0], (KSIZE, N_MEL, DIM), f32),
        "b_emb": jnp.zeros((1, DIM), f32),
        "g0": jnp.ones((1, DIM), f32), "bt0": jnp.zeros((1, DIM), f32),
        "w_dw": 0.1 * jax.random.normal(keys[1], (KSIZE, DIM), f32),
        "b_dw": jnp.zeros((1, DIM), f32),
        "g1": jnp.ones((1, DIM), f32), "bt1": jnp.zeros((1, DIM), f32),
        "w_p1": 0.1 * jax.random.normal(keys[2], (DIM, INTER), f32),
        "b_p1": jnp.zeros((1, INTER), f32),
        "w_p2": 0.1 * jax.random.normal(keys[3], (INTER, DIM), f32),
        "b_p2": jnp.zeros((1, DIM), f32),
        "gam": 0.1 * jnp.ones((1, DIM), f32),
        "g2": jnp.ones((1, DIM), f32), "bt2": jnp.zeros((1, DIM), f32),
        "w_mag": 0.1 * jax.random.normal(keys[4], (DIM, NFREQ), f32),
        "b_mag": jnp.zeros((1, NFREQ), f32),
        "w_ph": 0.1 * jax.random.normal(keys[5], (DIM, NFREQ), f32),
        "b_ph": jnp.zeros((1, NFREQ), f32),
    }


if __name__ == "__main__":
    params = make_params()
    denoised = jax.random.normal(jax.random.PRNGKey(0), (B, T_TOTAL, N_MEL), jnp.float32)
    ref_signal_len = REF_LEN

    out = f5_decode(denoised, ref_signal_len, params)
    out = jax.block_until_ready(out)
    assert out.shape == (B, L_OUT) and out.dtype == jnp.int16
    print("KERNEL_OK")
</pallas_src>

<mosaic_0001>
module attributes {stable_mosaic.version = 11 : i64} {
  func.func @decode_kernel(%arg0: memref<32x112xf32, #tpu.memory_space<vmem>>, %arg1: memref<112x32xf32, #tpu.memory_space<vmem>>, %arg2: memref<224x32xf32, #tpu.memory_space<vmem>>, %arg3: memref<20x128xf32, #tpu.memory_space<vmem>>, %arg4: memref<32x64xf32, #tpu.memory_space<vmem>>, %arg5: memref<64x32xf32, #tpu.memory_space<vmem>>, %arg6: memref<64x9xf32, #tpu.memory_space<vmem>>, %arg7: memref<2x9x512xf32, #tpu.memory_space<vmem>>, %arg8: memref<512x128xf32, #tpu.memory_space<vmem>>, %arg9: memref<2x128xf32, #tpu.memory_space<vmem>>) attributes {dimension_semantics = [], scalar_prefetch = 0 : i64, scratch_operands = 0 : i64, tpu.core_type = #tpu.core_type<tc>} {
    %c0 = arith.constant 0 : index
    %c0_0 = arith.constant 0 : index
    %0 = vector.load %arg0[%c0, %c0_0] : memref<32x112xf32, #tpu.memory_space<vmem>>, vector<32x112xf32>
    %c0_1 = arith.constant 0 : index
    %c0_2 = arith.constant 0 : index
    %1 = vector.load %arg1[%c0_1, %c0_2] : memref<112x32xf32, #tpu.memory_space<vmem>>, vector<112x32xf32>
    %cst = arith.constant dense<0.000000e+00> : vector<32x32xf32>
    %2 = tpu.matmul %0, %1, %cst {dimension_numbers = #tpu.dot_dimension_numbers<[1], [0], [0], [1], [0, 0, 1, 1], [], []>} : vector<32x112xf32>, vector<112x32xf32>, vector<32x32xf32> -> vector<32x32xf32>
    %c0_3 = arith.constant 0 : index
    %c0_4 = arith.constant 0 : index
    %3 = vector.load %arg3[%c0_3, %c0_4] : memref<20x128xf32, #tpu.memory_space<vmem>>, vector<1x32xf32>
    %4 = vector.broadcast %3 : vector<1x32xf32> to vector<32x32xf32>
    %5 = arith.addf %2, %4 : vector<32x32xf32>
    %c1 = arith.constant 1 : index
    %c0_5 = arith.constant 0 : index
    %6 = vector.load %arg3[%c1, %c0_5] : memref<20x128xf32, #tpu.memory_space<vmem>>, vector<1x32xf32>
    %c2 = arith.constant 2 : index
    %c0_6 = arith.constant 0 : index
    %7 = vector.load %arg3[%c2, %c0_6] : memref<20x128xf32, #tpu.memory_space<vmem>>, vector<1x32xf32>
    %cst_7 = arith.constant dense<0.000000e+00> : vector<32xf32>
    %8 = vector.multi_reduction <add>, %5, %cst_7 [1] : vector<32x32xf32> to vector<32xf32>
    %9 = vector.shape_cast %8 : vector<32xf32> to vector<32x1xf32>
    %cst_8 = arith.constant 3.200000e+01 : f32
    %10 = vector.broadcast %cst_8 : f32 to vector<32x1xf32>
    %11 = arith.divf %9, %10 : vector<32x1xf32>
    %12 = vector.broadcast %11 : vector<32x1xf32> to vector<32x32xf32>
    %13 = arith.subf %5, %12 : vector<32x32xf32>
    %14 = arith.mulf %13, %13 : vector<32x32xf32>
    %cst_9 = arith.constant dense<0.000000e+00> : vector<32xf32>
    %15 = vector.multi_reduction <add>, %14, %cst_9 [1] : vector<32x32xf32> to vector<32xf32>
    %16 = vector.shape_cast %15 : vector<32xf32> to vector<32x1xf32>
    %cst_10 = arith.constant 3.200000e+01 : f32
    %17 = vector.broadcast %cst_10 : f32 to vector<32x1xf32>
    %18 = arith.divf %16, %17 : vector<32x1xf32>
    %cst_11 = arith.constant 9.99999997E-7 : f32
    %19 = vector.broadcast %cst_11 : f32 to vector<32x1xf32>
    %20 = arith.addf %18, %19 : vector<32x1xf32>
    %21 = math.rsqrt %20 : vector<32x1xf32>
    %22 = vector.broadcast %21 : vector<32x1xf32> to vector<32x32xf32>
    %23 = arith.mulf %13, %22 : vector<32x32xf32>
    %24 = vector.broadcast %6 : vector<1x32xf32> to vector<32x32xf32>
    %25 = arith.mulf %23, %24 : vector<32x32xf32>
    %26 = vector.broadcast %7 : vector<1x32xf32> to vector<32x32xf32>
    %27 = arith.addf %25, %26 : vector<32x32xf32>
    %c0_12 = arith.constant 0 : index
    %c0_13 = arith.constant 0 : index
    %28 = vector.load %arg2[%c0_12, %c0_13] : memref<224x32xf32, #tpu.memory_space<vmem>>, vector<224x32xf32>
    %cst_14 = arith.constant dense<0.000000e+00> : vector<224x32xf32>
    %29 = tpu.matmul %28, %27, %cst_14 {dimension_numbers = #tpu.dot_dimension_numbers<[1], [0], [0], [1], [0, 0, 1, 1], [], []>} : vector<224x32xf32>, vector<32x32xf32>, vector<224x32xf32> -> vector<224x32xf32>
    %cst_15 = arith.constant 0.000000e+00 : f32
    %30 = vector.broadcast %cst_15 : f32 to vector<32x32xf32>
    %31 = vector.extract_strided_slice %29 {offsets = [0, 0], sizes = [32, 32], strides = [1, 1]} : vector<224x32xf32> to vector<32x32xf32>
    %c13 = arith.constant 13 : index
    %c0_16 = arith.constant 0 : index
    %32 = vector.load %arg3[%c13, %c0_16] : memref<20x128xf32, #tpu.memory_space<vmem>>, vector<1x32xf32>
    %33 = vector.broadcast %32 : vector<1x32xf32> to vector<32x32xf32>
    %34 = arith.mulf %31, %33 : vector<32x32xf32>
    %35 = arith.addf %30, %34 : vector<32x32xf32>
    %36 = vector.extract_strided_slice %29 {offsets = [32, 0], sizes = [32, 32], strides = [1, 1]} : vector<224x32xf32> to vector<32x32xf32>
    %c14 = arith.constant 14 : index
    %c0_17 = arith.constant 0 : index
    %37 = vector.load %arg3[%c14, %c0_17] : memref<20x128xf32, #tpu.memory_space<vmem>>, vector<1x32xf32>
    %38 = vector.broadcast %37 : vector<1x32xf32> to vector<32x32xf32>
    %39 = arith.mulf %36, %38 : vector<32x32xf32>
    %40 = arith.addf %35, %39 : vector<32x32xf32>
    %41 = vector.extract_strided_slice %29 {offsets = [64, 0], sizes = [32, 32], strides = [1, 1]} : vector<224x32xf32> to vector<32x32xf32>
    %c15 = arith.constant 15 : index
    %c0_18 = arith.constant 0 : index
    %42 = vector.load %arg3[%c15, %c0_18] : memref<20x128xf32, #tpu.memory_space<vmem>>, vector<1x32xf32>
    %43 = vector.broadcast %42 : vector<1x32xf32> to vector<32x32xf32>
    %44 = arith.mulf %41, %43 : vector<32x32xf32>
    %45 = arith.addf %40, %44 : vector<32x32xf32>
    %46 = vector.extract_strided_slice %29 {offsets = [96, 0], sizes = [32, 32], strides = [1, 1]} : vector<224x32xf32> to vector<32x32xf32>
    %c16 = arith.constant 16 : index
    %c0_19 = arith.constant 0 : index
    %47 = vector.load %arg3[%c16, %c0_19] : memref<20x128xf32, #tpu.memory_space<vmem>>, vector<1x32xf32>
    %48 = vector.broadcast %47 : vector<1x32xf32> to vector<32x32xf32>
    %49 = arith.mulf %46, %48 : vector<32x32xf32>
    %50 = arith.addf %45, %49 : vector<32x32xf32>
    %51 = vector.extract_strided_slice %29 {offsets = [128, 0], sizes = [32, 32], strides = [1, 1]} : vector<224x32xf32> to vector<32x32xf32>
    %c17 = arith.constant 17 : index
    %c0_20 = arith.constant 0 : index
    %52 = vector.load %arg3[%c17, %c0_20] : memref<20x128xf32, #tpu.memory_space<vmem>>, vector<1x32xf32>
    %53 = vector.broadcast %52 : vector<1x32xf32> to vector<32x32xf32>
    %54 = arith.mulf %51, %53 : vector<32x32xf32>
    %55 = arith.addf %50, %54 : vector<32x32xf32>
    %56 = vector.extract_strided_slice %29 {offsets = [160, 0], sizes = [32, 32], strides = [1, 1]} : vector<224x32xf32> to vector<32x32xf32>
    %c18 = arith.constant 18 : index
    %c0_21 = arith.constant 0 : index
    %57 = vector.load %arg3[%c18, %c0_21] : memref<20x128xf32, #tpu.memory_space<vmem>>, vector<1x32xf32>
    %58 = vector.broadcast %57 : vector<1x32xf32> to vector<32x32xf32>
    %59 = arith.mulf %56, %58 : vector<32x32xf32>
    %60 = arith.addf %55, %59 : vector<32x32xf32>
    %61 = vector.extract_strided_slice %29 {offsets = [192, 0], sizes = [32, 32], strides = [1, 1]} : vector<224x32xf32> to vector<32x32xf32>
    %c19 = arith.constant 19 : index
    %c0_22 = arith.constant 0 : index
    %62 = vector.load %arg3[%c19, %c0_22] : memref<20x128xf32, #tpu.memory_space<vmem>>, vector<1x32xf32>
    %63 = vector.broadcast %62 : vector<1x32xf32> to vector<32x32xf32>
    %64 = arith.mulf %61, %63 : vector<32x32xf32>
    %65 = arith.addf %60, %64 : vector<32x32xf32>
    %c3 = arith.constant 3 : index
    %c0_23 = arith.constant 0 : index
    %66 = vector.load %arg3[%c3, %c0_23] : memref<20x128xf32, #tpu.memory_space<vmem>>, vector<1x32xf32>
    %67 = vector.broadcast %66 : vector<1x32xf32> to vector<32x32xf32>
    %68 = arith.addf %65, %67 : vector<32x32xf32>
    %c4 = arith.constant 4 : index
    %c0_24 = arith.constant 0 : index
    %69 = vector.load %arg3[%c4, %c0_24] : memref<20x128xf32, #tpu.memory_space<vmem>>, vector<1x32xf32>
    %c5 = arith.constant 5 : index
    %c0_25 = arith.constant 0 : index
    %70 = vector.load %arg3[%c5, %c0_25] : memref<20x128xf32, #tpu.memory_space<vmem>>, vector<1x32xf32>
    %cst_26 = arith.constant dense<0.000000e+00> : vector<32xf32>
    %71 = vector.multi_reduction <add>, %68, %cst_26 [1] : vector<32x32xf32> to vector<32xf32>
    %72 = vector.shape_cast %71 : vector<32xf32> to vector<32x1xf32>
    %cst_27 = arith.constant 3.200000e+01 : f32
    %73 = vector.broadcast %cst_27 : f32 to vector<32x1xf32>
    %74 = arith.divf %72, %73 : vector<32x1xf32>
    %75 = vector.broadcast %74 : vector<32x1xf32> to vector<32x32xf32>
    %76 = arith.subf %68, %75 : vector<32x32xf32>
    %77 = arith.mulf %76, %76 : vector<32x32xf32>
    %cst_28 = arith.constant dense<0.000000e+00> : vector<32xf32>
    %78 = vector.multi_reduction <add>, %77, %cst_28 [1] : vector<32x32xf32> to vector<32xf32>
    %79 = vector.shape_cast %78 : vector<32xf32> to vector<32x1xf32>
    %cst_29 = arith.constant 3.200000e+01 : f32
    %80 = vector.broadcast %cst_29 : f32 to vector<32x1xf32>
    %81 = arith.divf %79, %80 : vector<32x1xf32>
    %cst_30 = arith.constant 9.99999997E-7 : f32
    %82 = vector.broadcast %cst_30 : f32 to vector<32x1xf32>
    %83 = arith.addf %81, %82 : vector<32x1xf32>
    %84 = math.rsqrt %83 : vector<32x1xf32>
    %85 = vector.broadcast %84 : vector<32x1xf32> to vector<32x32xf32>
    %86 = arith.mulf %76, %85 : vector<32x32xf32>
    %87 = vector.broadcast %69 : vector<1x32xf32> to vector<32x32xf32>
    %88 = arith.mulf %86, %87 : vector<32x32xf32>
    %89 = vector.broadcast %70 : vector<1x32xf32> to vector<32x32xf32>
    %90 = arith.addf %88, %89 : vector<32x32xf32>
    %c0_31 = arith.constant 0 : index
    %c0_32 = arith.constant 0 : index
    %91 = vector.load %arg4[%c0_31, %c0_32] : memref<32x64xf32, #tpu.memory_space<vmem>>, vector<32x64xf32>
    %cst_33 = arith.constant dense<0.000000e+00> : vector<32x64xf32>
    %92 = tpu.matmul %90, %91, %cst_33 {dimension_numbers = #tpu.dot_dimension_numbers<[1], [0], [0], [1], [0, 0, 1, 1], [], []>} : vector<32x32xf32>, vector<32x64xf32>, vector<32x64xf32> -> vector<32x64xf32>
    %c6 = arith.constant 6 : index
    %c0_34 = arith.constant 0 : index
    %93 = vector.load %arg3[%c6, %c0_34] : memref<20x128xf32, #tpu.memory_space<vmem>>, vector<1x64xf32>
    %94 = vector.broadcast %93 : vector<1x64xf32> to vector<32x64xf32>
    %95 = arith.addf %92, %94 : vector<32x64xf32>
    %96 = arith.mulf %95, %95 : vector<32x64xf32>
    %97 = arith.mulf %95, %96 : vector<32x64xf32>
    %cst_35 = arith.constant 4.471500e-02 : f32
    %98 = vector.broadcast %cst_35 : f32 to vector<32x64xf32>
    %99 = arith.mulf %98, %97 : vector<32x64xf32>
    %100 = arith.addf %95, %99 : vector<32x64xf32>
    %cst_36 = arith.constant 0.797884583 : f32
    %101 = vector.broadcast %cst_36 : f32 to vector<32x64xf32>
    %102 = arith.mulf %101, %100 : vector<32x64xf32>
    %103 = math.tanh %102 : vector<32x64xf32>
    %cst_37 = arith.constant 1.000000e+00 : f32
    %104 = vector.broadcast %cst_37 : f32 to vector<32x64xf32>
    %105 = arith.addf %104, %103 : vector<32x64xf32>
    %cst_38 = arith.constant 5.000000e-01 : f32
    %106 = vector.broadcast %cst_38 : f32 to vector<32x64xf32>
    %107 = arith.mulf %106, %105 : vector<32x64xf32>
    %108 = arith.mulf %95, %107 : vector<32x64xf32>
    %c0_39 = arith.constant 0 : index
    %c0_40 = arith.constant 0 : index
    %109 = vector.load %arg5[%c0_39, %c0_40] : memref<64x32xf32, #tpu.memory_space<vmem>>, vector<64x32xf32>
    %cst_41 = arith.constant dense<0.000000e+00> : vector<32x32xf32>
    %110 = tpu.matmul %108, %109, %cst_41 {dimension_numbers = #tpu.dot_dimension_numbers<[1], [0], [0], [1], [0, 0, 1, 1], [], []>} : vector<32x64xf32>, vector<64x32xf32>, vector<32x32xf32> -> vector<32x32xf32>
    %c7 = arith.constant 7 : index
    %c0_42 = arith.constant 0 : index
    %111 = vector.load %arg3[%c7, %c0_42] : memref<20x128xf32, #tpu.memory_space<vmem>>, vector<1x32xf32>
    %112 = vector.broadcast %111 : vector<1x32xf32> to vector<32x32xf32>
    %113 = arith.addf %110, %112 : vector<32x32xf32>
    %c8 = arith.constant 8 : index
    %c0_43 = arith.constant 0 : index
    %114 = vector.load %arg3[%c8, %c0_43] : memref<20x128xf32, #tpu.memory_space<vmem>>, vector<1x32xf32>
    %115 = vector.broadcast %114 : vector<1x32xf32> to vector<32x32xf32>
    %116 = arith.mulf %115, %113 : vector<32x32xf32>
    %117 = arith.addf %27, %116 : vector<32x32xf32>
    %c9 = arith.constant 9 : index
    %c0_44 = arith.constant 0 : index
    %118 = vector.load %arg3[%c9, %c0_44] : memref<20x128xf32, #tpu.memory_space<vmem>>, vector<1x32xf32>
    %c10 = arith.constant 10 : index
    %c0_45 = arith.constant 0 : index
    %119 = vector.load %arg3[%c10, %c0_45] : memref<20x128xf32, #tpu.memory_space<vmem>>, vector<1x32xf32>
    %cst_46 = arith.constant dense<0.000000e+00> : vector<32xf32>
    %120 = vector.multi_reduction <add>, %117, %cst_46 [1] : vector<32x32xf32> to vector<32xf32>
    %121 = vector.shape_cast %120 : vector<32xf32> to vector<32x1xf32>
    %cst_47 = arith.constant 3.200000e+01 : f32
    %122 = vector.broadcast %cst_47 : f32 to vector<32x1xf32>
    %123 = arith.divf %121, %122 : vector<32x1xf32>
    %124 = vector.broadcast %123 : vector<32x1xf32> to vector<32x32xf32>
    %125 = arith.subf %117, %124 : vector<32x32xf32>
    %126 = arith.mulf %125, %125 : vector<32x32xf32>
    %cst_48 = arith.constant dense<0.000000e+00> : vector<32xf32>
    %127 = vector.multi_reduction <add>, %126, %cst_48 [1] : vector<32x32xf32> to vector<32xf32>
    %128 = vector.shape_cast %127 : vector<32xf32> to vector<32x1xf32>
    %cst_49 = arith.constant 3.200000e+01 : f32
    %129 = vector.broadcast %cst_49 : f32 to vector<32x1xf32>
    %130 = arith.divf %128, %129 : vector<32x1xf32>
    %cst_50 = arith.constant 9.99999997E-7 : f32
    %131 = vector.broadcast %cst_50 : f32 to vector<32x1xf32>
    %132 = arith.addf %130, %131 : vector<32x1xf32>
    %133 = math.rsqrt %132 : vector<32x1xf32>
    %134 = vector.broadcast %133 : vector<32x1xf32> to vector<32x32xf32>
    %135 = arith.mulf %125, %134 : vector<32x32xf32>
    %136 = vector.broadcast %118 : vector<1x32xf32> to vector<32x32xf32>
    %137 = arith.mulf %135, %136 : vector<32x32xf32>
    %138 = vector.broadcast %119 : vector<1x32xf32> to vector<32x32xf32>
    %139 = arith.addf %137, %138 : vector<32x32xf32>
    %c0_51 = arith.constant 0 : index
    %c0_52 = arith.constant 0 : index
    %140 = vector.load %arg6[%c0_51, %c0_52] : memref<64x9xf32, #tpu.memory_space<vmem>>, vector<32x9xf32>
    %cst_53 = arith.constant dense<0.000000e+00> : vector<32x9xf32>
    %141 = tpu.matmul %139, %140, %cst_53 {dimension_numbers = #tpu.dot_dimension_numbers<[1], [0], [0], [1], [0, 0, 1, 1], [], []>} : vector<32x32xf32>, vector<32x9xf32>, vector<32x9xf32> -> vector<32x9xf32>
    %c11 = arith.constant 11 : index
    %c0_54 = arith.constant 0 : index
    %142 = vector.load %arg3[%c11, %c0_54] : memref<20x128xf32, #tpu.memory_space<vmem>>, vector<1x9xf32>
    %143 = vector.broadcast %142 : vector<1x9xf32> to vector<32x9xf32>
    %144 = arith.addf %141, %143 : vector<32x9xf32>
    %c32 = arith.constant 32 : index
    %c0_55 = arith.constant 0 : index
    %145 = vector.load %arg6[%c32, %c0_55] : memref<64x9xf32, #tpu.memory_space<vmem>>, vector<32x9xf32>
    %cst_56 = arith.constant dense<0.000000e+00> : vector<32x9xf32>
    %146 = tpu.matmul %139, %145, %cst_56 {dimension_numbers = #tpu.dot_dimension_numbers<[1], [0], [0], [1], [0, 0, 1, 1], [], []>} : vector<32x32xf32>, vector<32x9xf32>, vector<32x9xf32> -> vector<32x9xf32>
    %c12 = arith.constant 12 : index
    %c0_57 = arith.constant 0 : index
    %147 = vector.load %arg3[%c12, %c0_57] : memref<20x128xf32, #tpu.memory_space<vmem>>, vector<1x9xf32>
    %148 = vector.broadcast %147 : vector<1x9xf32> to vector<32x9xf32>
    %149 = arith.addf %146, %148 : vector<32x9xf32>
    %150 = math.exp %144 : vector<32x9xf32>
    %cst_58 = arith.constant 1.000000e+02 : f32
    %151 = vector.broadcast %cst_58 : f32 to vector<32x9xf32>
    %152 = arith.minimumf %150, %151 : vector<32x9xf32>
    %153 = math.cos %149 : vector<32x9xf32>
    %154 = arith.mulf %152, %153 : vector<32x9xf32>
    %155 = math.sin %149 : vector<32x9xf32>
    %156 = arith.mulf %152, %155 : vector<32x9xf32>
    %c0_59 = arith.constant 0 : index
    %c0_60 = arith.constant 0 : index
    %c0_61 = arith.constant 0 : index
    %157 = vector.load %arg7[%c0_59, %c0_60, %c0_61] : memref<2x9x512xf32, #tpu.memory_space<vmem>>, vector<1x9x512xf32>
    %158 = vector.shape_cast %157 : vector<1x9x512xf32> to vector<9x512xf32>
    %cst_62 = arith.constant dense<0.000000e+00> : vector<32x512xf32>
    %159 = tpu.matmul %154, %158, %cst_62 {dimension_numbers = #tpu.dot_dimension_numbers<[1], [0], [0], [1], [0, 0, 1, 1], [], []>} : vector<32x9xf32>, vector<9x512xf32>, vector<32x512xf32> -> vector<32x512xf32>
    %c1_63 = arith.constant 1 : index
    %c0_64 = arith.constant 0 : index
    %c0_65 = arith.constant 0 : index
    %160 = vector.load %arg7[%c1_63, %c0_64, %c0_65] : memref<2x9x512xf32, #tpu.memory_space<vmem>>, vector<1x9x512xf32>
    %161 = vector.shape_cast %160 : vector<1x9x512xf32> to vector<9x512xf32>
    %cst_66 = arith.constant dense<0.000000e+00> : vector<32x512xf32>
    %162 = tpu.matmul %156, %161, %cst_66 {dimension_numbers = #tpu.dot_dimension_numbers<[1], [0], [0], [1], [0, 0, 1, 1], [], []>} : vector<32x9xf32>, vector<9x512xf32>, vector<32x512xf32> -> vector<32x512xf32>
    %163 = arith.addf %159, %162 : vector<32x512xf32>
    %164 = tpu.iota {dimensions = array<i32: 0>} : vector<32x512xi32>
    %165 = tpu.iota {dimensions = array<i32: 1>} : vector<32x512xi32>
    %c15_i32 = arith.constant 15 : i32
    %166 = vector.broadcast %c15_i32 : i32 to vector<32x512xi32>
    %167 = arith.andi %164, %166 : vector<32x512xi32>
    %c32_i32 = arith.constant 32 : i32
    %168 = vector.broadcast %c32_i32 : i32 to vector<32x512xi32>
    %169 = arith.muli %167, %168 : vector<32x512xi32>
    %170 = arith.cmpi sge, %165, %169 : vector<32x512xi32>
    %c32_i32_67 = arith.constant 32 : i32
    %171 = vector.broadcast %c32_i32_67 : i32 to vector<32x512xi32>
    %172 = arith.addi %169, %171 : vector<32x512xi32>
    %173 = arith.cmpi slt, %165, %172 : vector<32x512xi32>
    %174 = arith.andi %170, %173 : vector<32x512xi1>
    %cst_68 = arith.constant 0.000000e+00 : f32
    %175 = vector.broadcast %cst_68 : f32 to vector<32x512xf32>
    %176 = arith.select %174, %163, %175 : vector<32x512xi1>, vector<32x512xf32>
    %177 = tpu.iota {dimensions = array<i32: 0>} : vector<2x32xi32>
    %178 = tpu.iota {dimensions = array<i32: 1>} : vector<2x32xi32>
    %c16_i32 = arith.constant 16 : i32
    %179 = vector.broadcast %c16_i32 : i32 to vector<2x32xi32>
    %180 = arith.muli %177, %179 : vector<2x32xi32>
    %181 = arith.cmpi sge, %178, %180 : vector<2x32xi32>
    %c1_i32 = arith.constant 1 : i32
    %182 = vector.broadcast %c1_i32 : i32 to vector<2x32xi32>
    %183 = arith.addi %177, %182 : vector<2x32xi32>
    %c16_i32_69 = arith.constant 16 : i32
    %184 = vector.broadcast %c16_i32_69 : i32 to vector<2x32xi32>
    %185 = arith.muli %183, %184 : vector<2x32xi32>
    %186 = arith.cmpi slt, %178, %185 : vector<2x32xi32>
    %187 = arith.andi %181, %186 : vector<2x32xi1>
    %cst_70 = arith.constant 1.000000e+00 : f32
    %cst_71 = arith.constant 0.000000e+00 : f32
    %188 = vector.broadcast %cst_70 : f32 to vector<2x32xf32>
    %189 = vector.broadcast %cst_71 : f32 to vector<2x32xf32>
    %190 = arith.select %187, %188, %189 : vector<2x32xi1>, vector<2x32xf32>
    %cst_72 = arith.constant dense<0.000000e+00> : vector<2x512xf32>
    %191 = tpu.matmul %190, %176, %cst_72 {dimension_numbers = #tpu.dot_dimension_numbers<[1], [0], [0], [1], [0, 0, 1, 1], [], []>} : vector<2x32xf32>, vector<32x512xf32>, vector<2x512xf32> -> vector<2x512xf32>
    %c0_73 = arith.constant 0 : index
    %c0_74 = arith.constant 0 : index
    %192 = vector.load %arg8[%c0_73, %c0_74] : memref<512x128xf32, #tpu.memory_space<vmem>>, vector<512x128xf32>
    %cst_75 = arith.constant dense<0.000000e+00> : vector<2x128xf32>
    %193 = tpu.matmul %191, %192, %cst_75 {dimension_numbers = #tpu.dot_dimension_numbers<[1], [0], [0], [1], [0, 0, 1, 1], [], []>} : vector<2x512xf32>, vector<512x128xf32>, vector<2x128xf32> -> vector<2x128xf32>
    %c0_76 = arith.constant 0 : index
    %c0_77 = arith.constant 0 : index
    %194 = vector.load %arg9[%c0_76, %c0_77] : memref<2x128xf32, #tpu.memory_space<vmem>>, vector<2x128xf32>
    tpu.vector_store %arg9[%c0_76, %c0_77], %193 {strides = array<i32>} : memref<2x128xf32, #tpu.memory_space<vmem>>, vector<2x128xf32>,
    return
  }
}

</mosaic_0001>

<bundles_post_ra>
// kernel: tpu_custom_call.1
= control target key start
LH: loop header
LB: loop body
LE: loop exit
PB: predicated region body
PF: predicated region fallthrough
CT: control target
= control target key end

     0   :  { %vm56_vm0 = vcmask 916480   ;;  %s5025_s0 = inlined_call_operand.vmem [shape: f32[32,112], index: 0, kind: input, shape index: {}]   ;;  %s5026_s1 = inlined_call_operand.vmem [shape: f32[112,32], index: 1, kind: input, shape index: {}]   ;;  %s5027_s2 = inlined_call_operand.vmem [shape: f32[224,32], index: 2, kind: input, shape index: {}]   ;;  %s5028_s3 = inlined_call_operand.vmem [shape: f32[20,128], index: 3, kind: input, shape index: {}]   ;;  %s5029_s4 = inlined_call_operand.vmem [shape: f32[32,64], index: 4, kind: input, shape index: {}]   ;;  %s5030_s5 = inlined_call_operand.vmem [shape: f32[64,32], index: 5, kind: input, shape index: {}]   ;;  %s5031_s6 = inlined_call_operand.vmem [shape: f32[64,9], index: 6, kind: input, shape index: {}]   ;;  %s5032_s7 = inlined_call_operand.vmem [shape: f32[2,9,512], index: 7, kind: input, shape index: {}]   ;;  %s5033_s8 = inlined_call_operand.vmem [shape: f32[512,128], index: 8, kind: input, shape index: {}]   ;;  %s5034_s9 = inlined_call_operand.hbm [shape: f32[2,128], index: 9, kind: output, shape index: {}]  }
   0x1   :  { %v37_v0 = vld [vmem:[%s5026_s1] sm:$0xff]  ;;  %v38_v1 = vld [vmem:[%s5026_s1 + $0x8] sm:$0xff]  ;;  %v39_v2 = vld [vmem:[%s5026_s1 + $0x10] sm:$0xff] }
   0x2   :  { %v3431_v3 = vpack.c.bf16 %v38_v1, %v37_v0  ;;  %v40_v4 = vld [vmem:[%s5026_s1 + $0x18] sm:$0xff]  ;;  %v41_v6 = vld [vmem:[%s5026_s1 + $0x20] sm:$0xff]  ;;  %v42_v7 = vld [vmem:[%s5026_s1 + $0x28] sm:$0xff] }
   0x3   :  { %v3435_v5 = vpack.c.bf16 %v40_v4, %v39_v2  ;;  %v33_v8 = vld [vmem:[%s5025_s0] sm:$0xff]  ;;  %v3439_v9 = vpack.c.bf16 %v42_v7, %v41_v6  ;;  %v43_v10 = vld [vmem:[%s5026_s1 + $0x30] sm:$0xff]  ;;  %v44_v11 = vld [vmem:[%s5026_s1 + $0x38] sm:$0xff] }
   0x4   :  { %3432 = vmatprep.subr.bf16.mxu0 %v3431_v3  ;;  %3311 = vmatprep.mubr.msk.f32.mxu0 %vm56_vm0, %v33_v8 }
   0x5   :  { %3434 = vmatpush3.bf16.msra.mxu0 %v3431_v3 }
   0x6   :  { %3436 = vmatprep.subr.bf16.mxu0 %v3435_v5 }
   0x7   :  { %14 = vsyncpa [#allocation3], 0  ;;  %v3443_v12 = vpack.c.bf16 %v44_v11, %v43_v10  ;;  %v45_v13 = vld [vmem:[%s5026_s1 + $0x40] sm:$0xff]  ;;  %v46_v14 = vld [vmem:[%s5026_s1 + $0x48] sm:$0xff]  ;;  %vm5035_vm1 = vcmask 261120   ;;  %vm868_vm2 = vcmask 523264  }
   0x8   :  { %v3447_v15 = vpack.c.bf16 %v46_v14, %v45_v13  ;;  %v47_v16 = vld [vmem:[%s5026_s1 + $0x50] sm:$0xff]  ;;  %v48_v17 = vld [vmem:[%s5026_s1 + $0x58] sm:$0xff]  ;;  %v49_v19 = vld [vmem:[%s5026_s1 + $0x60] sm:$0xff]  ;;  %vm2127_vm3 = vcmask 1040384   ;;  %vm3740_vm4 = vmmov 1   ;;  %s3748_s25 = smov [#allocation2]  }
   0x9   :  { %3438 = vmatpush3.bf16.msra.mxu0 %v3435_v5  ;;  %v3451_v18 = vpack.c.bf16 %v48_v17, %v47_v16  ;;  %v50_v20 = vld [vmem:[%s5026_s1 + $0x68] sm:$0xff]  ;;  %v35_v23 = vld [vmem:[%s5025_s0 + $0x10] sm:$0xff]  ;;  %v36_v24 = vld [vmem:[%s5025_s0 + $0x18] sm:$0xff]  ;;  %s2969_s26 = sshll.u32 %s3748_s25, 4  ;;  %s2970_s26 = int_to_ptr.vmem [resolvable:$true] %s2969_s26 }
   0xa   :  { %3440 = vmatprep.subr.bf16.mxu0 %v3439_v9  ;;  %v3455_v21 = vpack.c.bf16 %v50_v20, %v49_v19  ;;  %v34_v22 = vld [vmem:[%s5025_s0 + $0x8] sm:$0xff]  ;;  %v2977_v25 = vld [vmem:[%s5028_s3] ss:$0 sm:$0xff]  ;;  %v2983_v14 = vld [vmem:[%s5028_s3 + $0x2] ss:$0 sm:$0xff]  ;;  %p3721_p1 = scmp.lt.s32.totalorder %s2970_s26, %s2970_s26 }
   0xb   :  { %v226_v58 = vld [vmem:[%s5027_s2] sm:$0xff]  ;;  %vm4149_vm5 = vmpackc.low %vm2127_vm3, %vm3740_vm4 }
   0xc   :  { %3325 = vmatprep.mubr.msk.f32.mxu1 %vm5035_vm1, %v226_v58  ;;  %v3012_v58 = vld [vmem:[%s5028_s3 + $0xd] ss:$0 sm:$0xff] }
   0xd   :  { %3442 = vmatpush3.bf16.msra.mxu0 %v3439_v9  ;;  %v2982_v9 = vld [vmem:[%s5028_s3 + $0x1] ss:$0 sm:$0xff] }
   0xe   :  { %3444 = vmatprep.subr.bf16.mxu0 %v3443_v12 }
  0x11   :  { %3446 = vmatpush3.bf16.msra.mxu0 %v3443_v12 }
  0x12   :  { %3448 = vmatprep.subr.bf16.mxu0 %v3447_v15 }
  0x15   :  { %3450 = vmatpush3.bf16.msra.mxu0 %v3447_v15 }
  0x16   :  { %3452 = vmatprep.subr.bf16.mxu0 %v3451_v18 }
  0x19   :  { %3454 = vmatpush3.bf16.msra.mxu0 %v3451_v18 }
  0x1a   :  { %3456 = vmatprep.subr.bf16.mxu0 %v3455_v21 }
  0x1d   :  { %3458 = vmatpush3.bf16.msra.mxu0 %v3455_v21 }
  0x20   :  { %3312 = vmatmul.mubr.msk.f32.vlgmr.msra.gmra.mrb[0].mxu0 %vm56_vm0, %v34_v22 }
  0x21   :  { %3314 = vmatprep.mubr.msk.f32.mxu0 %vm56_vm0, %v35_v23 }
  0x24   :  { %3315 = vmatmul.mubr.msk.f32.gmra.mrb[2].mxu0 %vm56_vm0, %v36_v24 }
  0xf3   :  { %v3313_v26 = vpop.f32.mrb[0].mxu0 }
  0xf4   :  { %v135_v27 = vpop.f32.mrb[1].mxu0  ;;  %v141_v29 = vadd.f32 %v3313_v26, %v2977_v25 }
  0xf5   :  { %v136_v28 = vadd.f32 %v2977_v25, %v135_v27  ;;  %v227_v27 = vld [vmem:[%s5027_s2 + $0x8] sm:$0xff] }
  0xf6   :  { %v160_v36 = vsel %vm5035_vm1, %v141_v29, 0.0 }
  0xf7   :  { %v3316_v30 = vpop.f32.mrb[2].mxu0  ;;  %v157_v31 = vsel %vm5035_vm1, %v136_v28, 0.0 }
  0xf8   :  { %v145_v32 = vpop.f32.mrb[3].mxu0  ;;  %158 = vadd.xlane.f32.xlu0 %v157_v31  ;;  %v151_v34 = vadd.f32 %v3316_v30, %v2977_v25  ;;  %v230_v30 = vld [vmem:[%s5027_s2 + $0x20] sm:$0xff]  ;;  %v231_v31 = vld [vmem:[%s5027_s2 + $0x28] sm:$0xff] }
  0xf9   :  { %v146_v33 = vadd.f32 %v2977_v25, %v145_v32  ;;  %v232_v32 = vld [vmem:[%s5027_s2 + $0x30] sm:$0xff] }
  0xfa   :  { %v166_v37 = vsel %vm5035_vm1, %v151_v34, 0.0 }
  0xfb   :  { %v163_v35 = vsel %vm5035_vm1, %v146_v33, 0.0 }
  0xfc   :  { %164 = vadd.xlane.f32.xlu1 %v163_v35  ;;  %161 = vadd.xlane.f32.xlu0 %v160_v36  ;;  %v235_v35 = vld [vmem:[%s5027_s2 + $0x48] sm:$0xff]  ;;  %v236_v36 = vld [vmem:[%s5027_s2 + $0x50] sm:$0xff] }
 0x100   :  { %167 = vadd.xlane.f32.xlu1 %v166_v37  ;;  %v237_v37 = vld [vmem:[%s5027_s2 + $0x58] sm:$0xff] }
 0x185   :  { %v159_v38 = vpop.xlane.xlu0 %158 }
 0x186   :  { %v170_v39 = vmul.f32 0.03125, %v159_v38  ;;  %v238_v38 = vld [vmem:[%s5027_s2 + $0x60] sm:$0xff] }
 0x188   :  { %v174_v40 = vsub.f32 %v136_v28, %v170_v39  ;;  %v228_v28 = vld [vmem:[%s5027_s2 + $0x10] sm:$0xff]  ;;  %v239_v39 = vld [vmem:[%s5027_s2 + $0x68] sm:$0xff] }
 0x189   :  { %v165_v41 = vpop.xlane.xlu1 %164  ;;  %v162_v42 = vpop.xlane.xlu0 %161 }
 0x18a   :  { %v172_v43 = vmul.f32 0.03125, %v165_v41  ;;  %v171_v44 = vmul.f32 0.03125, %v162_v42  ;;  %v178_v45 = vmul.f32 %v174_v40, %v174_v40  ;;  %v241_v41 = vld [vmem:[%s5027_s2 + $0x78] sm:$0xff]  ;;  %v242_v42 = vld [vmem:[%s5027_s2 + $0x80] sm:$0xff] }
 0x18c   :  { %v176_v46 = vsub.f32 %v146_v33, %v172_v43  ;;  %v175_v47 = vsub.f32 %v141_v29, %v171_v44  ;;  %v182_v48 = vsel %vm5035_vm1, %v178_v45, 0.0  ;;  %v229_v29 = vld [vmem:[%s5027_s2 + $0x18] sm:$0xff]  ;;  %v243_v43 = vld [vmem:[%s5027_s2 + $0x88] sm:$0xff]  ;;  %v244_v44 = vld [vmem:[%s5027_s2 + $0x90] sm:$0xff] }
 0x18d   :  { %v168_v49 = vpop.xlane.xlu1 %167  ;;  %183 = vadd.xlane.f32.xlu0 %v182_v48  ;;  %v233_v33 = vld [vmem:[%s5027_s2 + $0x38] sm:$0xff]  ;;  %v248_v48 = vld [vmem:[%s5027_s2 + $0xb0] sm:$0xff] }
 0x18e   :  { %v173_v50 = vmul.f32 0.03125, %v168_v49  ;;  %v180_v51 = vmul.f32 %v176_v46, %v176_v46  ;;  %v179_v52 = vmul.f32 %v175_v47, %v175_v47  ;;  %v245_v45 = vld [vmem:[%s5027_s2 + $0x98] sm:$0xff] }
 0x18f   :  { %v249_v49 = vld [vmem:[%s5027_s2 + $0xb8] sm:$0xff] }
 0x190   :  { %v177_v53 = vsub.f32 %v151_v34, %v173_v50  ;;  %v188_v54 = vsel %vm5035_vm1, %v180_v51, 0.0  ;;  %v185_v55 = vsel %vm5035_vm1, %v179_v52, 0.0  ;;  %v234_v34 = vld [vmem:[%s5027_s2 + $0x40] sm:$0xff]  ;;  %v251_v51 = vld [vmem:[%s5027_s2 + $0xc8] sm:$0xff]  ;;  %v252_v52 = vld [vmem:[%s5027_s2 + $0xd0] sm:$0xff] }
 0x191   :  { %189 = vadd.xlane.f32.xlu0 %v188_v54  ;;  %186 = vadd.xlane.f32.xlu1 %v185_v55  ;;  %v250_v50 = vld [vmem:[%s5027_s2 + $0xc0] sm:$0xff] }
 0x192   :  { %v181_v56 = vmul.f32 %v177_v53, %v177_v53 }
 0x194   :  { %v191_v57 = vsel %vm5035_vm1, %v181_v56, 0.0 }
 0x195   :  { %192 = vadd.xlane.f32.xlu1 %v191_v57 }
 0x21a   :  { %v184_v59 = vpop.xlane.xlu0 %183 }
 0x21b   :  { %v194_v60 = vmul.f32 0.03125, %v184_v59  ;;  %v3013_v59 = vld [vmem:[%s5028_s3 + $0xe] ss:$0 sm:$0xff] }
 0x21d   :  { %v198_v61 = vadd.f32 1e-06, %v194_v60 }
 0x21e   :  { %v187_v62 = vpop.xlane.xlu1 %186  ;;  %v190_v63 = vpop.xlane.xlu0 %189 }
 0x21f   :  { %3660 = vrsqrt.f32 %v198_v61  ;;  %v195_v0 = vmul.f32 0.03125, %v187_v62  ;;  %v196_v1 = vmul.f32 0.03125, %v190_v63 }
 0x221   :  { %v199_v2 = vadd.f32 1e-06, %v195_v0  ;;  %v200_v3 = vadd.f32 1e-06, %v196_v1 }
 0x222   :  { %v193_v4 = vpop.xlane.xlu1 %192 }
 0x223   :  { %3662 = vrsqrt.f32 %v199_v2  ;;  %v197_v5 = vmul.f32 0.03125, %v193_v4 }
 0x224   :  { %3664 = vrsqrt.f32 %v200_v3 }
 0x225   :  { %v201_v6 = vadd.f32 1e-06, %v197_v5 }
 0x227   :  { %3666 = vrsqrt.f32 %v201_v6 }
 0x229   :  { %v3661_v7 = vpop.eup %3660 }
 0x22a   :  { %v206_v8 = vmul.f32 %v3661_v7, %v174_v40  ;;  %v240_v40 = vld [vmem:[%s5027_s2 + $0x70] sm:$0xff] }
 0x22c   :  { %v214_v13 = vmul.f32 %v2982_v9, %v206_v8 }
 0x22d   :  { %v3663_v10 = vpop.eup %3662 }
 0x22e   :  { %v3665_v11 = vpop.eup %3664  ;;  %v207_v12 = vmul.f32 %v3663_v10, %v175_v47  ;;  %v3878_v18 = vadd.f32 %v2983_v14, %v214_v13  ;;  %v247_v47 = vld [vmem:[%s5027_s2 + $0xa8] sm:$0xff] }
 0x22f   :  { %v208_v15 = vmul.f32 %v3665_v11, %v176_v46  ;;  %v246_v46 = vld [vmem:[%s5027_s2 + $0xa0] sm:$0xff]  ;;  %v3014_v10 = vld [vmem:[%s5028_s3 + $0xf] ss:$0 sm:$0xff] }
 0x230   :  { %v215_v16 = vmul.f32 %v2982_v9, %v207_v12 }
 0x231   :  { %v3667_v17 = vpop.eup %3666  ;;  %v216_v21 = vmul.f32 %v2982_v9, %v208_v15 }
 0x232   :  { %v3880_v19 = vadd.f32 %v2983_v14, %v215_v16  ;;  %v209_v20 = vmul.f32 %v3667_v17, %v177_v53  ;;  %v253_v53 = vld [vmem:[%s5027_s2 + $0xd8] sm:$0xff] }
 0x233   :  { %v3884_v24 = vadd.f32 %v2983_v14, %v216_v21 }
 0x234   :  { %v3459_v22 = vpack.c.bf16 %v3880_v19, %v3878_v18  ;;  %v217_v23 = vmul.f32 %v2982_v9, %v209_v20 }
 0x236   :  { %3460 = vmatprep.subr.bf16.mxu1 %v3459_v22  ;;  %v3886_v25 = vadd.f32 %v2983_v14, %v217_v23 }
 0x237   :  { %3462 = vmatpush3.bf16.msra.mxu1 %v3459_v22 }
 0x238   :  { %v3463_v26 = vpack.c.bf16 %v3886_v25, %v3884_v24 }
 0x23a   :  { %3464 = vmatprep.subr.bf16.mxu1 %v3463_v26 }
 0x23b   :  { %3466 = vmatpush3.bf16.msra.mxu1 %v3463_v26 }
 0x23e   :  { %3326 = vmatmul.mubr.msk.f32.vlgmr.msra.gmra.mrb[0].mxu1 %vm5035_vm1, %v227_v27  ;;  %v3015_v27 = vld [vmem:[%s5028_s3 + $0x10] ss:$0 sm:$0xff] }
 0x23f   :  { %3328 = vmatprep.mubr.msk.f32.mxu1 %vm5035_vm1, %v228_v28 }
 0x242   :  { %3329 = vmatmul.mubr.msk.f32.gmra.mrb[2].mxu1 %vm5035_vm1, %v229_v29 }
 0x243   :  { %3331 = vmatprep.mubr.msk.f32.mxu1 %vm5035_vm1, %v230_v30 }
 0x246   :  { %3332 = vmatmul.mubr.msk.f32.gmra.mrb[4].mxu1 %vm5035_vm1, %v231_v31 }
 0x247   :  { %3334 = vmatprep.mubr.msk.f32.mxu1 %vm5035_vm1, %v232_v32 }
 0x24a   :  { %3335 = vmatmul.mubr.msk.f32.gmra.mrb[6].mxu1 %vm5035_vm1, %v233_v33 }
 0x24b   :  { %3337 = vmatprep.mubr.msk.f32.mxu1 %vm5035_vm1, %v234_v34 }
 0x24e   :  { %3338 = vmatmul.mubr.msk.f32.gmra.mrb[8].mxu1 %vm5035_vm1, %v235_v35 }
 0x24f   :  { %3340 = vmatprep.mubr.msk.f32.mxu1 %vm5035_vm1, %v236_v36 }
 0x252   :  { %3341 = vmatmul.mubr.msk.f32.gmra.mrb[10].mxu1 %vm5035_vm1, %v237_v37 }
 0x253   :  { %3343 = vmatprep.mubr.msk.f32.mxu1 %vm5035_vm1, %v238_v38 }
 0x256   :  { %3344 = vmatmul.mubr.msk.f32.gmra.mrb[12].mxu1 %vm5035_vm1, %v239_v39 }
 0x257   :  { %3346 = vmatprep.mubr.msk.f32.mxu1 %vm5035_vm1, %v240_v40  ;;  %v3016_v40 = vld [vmem:[%s5028_s3 + $0x11] ss:$0 sm:$0xff] }
 0x25a   :  { %3347 = vmatmul.mubr.msk.f32.gmra.mrb[14].mxu1 %vm5035_vm1, %v241_v41 }
 0x25b   :  { %3349 = vmatprep.mubr.msk.f32.mxu1 %vm5035_vm1, %v242_v42 }
 0x25e   :  { %3350 = vmatmul.mubr.msk.f32.gmra.mrb[16].mxu1 %vm5035_vm1, %v243_v43 }
 0x25f   :  { %3352 = vmatprep.mubr.msk.f32.mxu1 %vm5035_vm1, %v244_v44 }
 0x262   :  { %3353 = vmatmul.mubr.msk.f32.gmra.mrb[18].mxu1 %vm5035_vm1, %v245_v45 }
 0x263   :  { %3355 = vmatprep.mubr.msk.f32.mxu1 %vm5035_vm1, %v246_v46 }
 0x266   :  { %3356 = vmatmul.mubr.msk.f32.gmra.mrb[20].mxu1 %vm5035_vm1, %v247_v47 }
 0x267   :  { %3358 = vmatprep.mubr.msk.f32.mxu1 %vm5035_vm1, %v248_v48 }
 0x26a   :  { %3359 = vmatmul.mubr.msk.f32.gmra.mrb[22].mxu1 %vm5035_vm1, %v249_v49 }
 0x26b   :  { %3361 = vmatprep.mubr.msk.f32.mxu1 %vm5035_vm1, %v250_v50 }
 0x26e   :  { %3362 = vmatmul.mubr.msk.f32.gmra.mrb[24].mxu1 %vm5035_vm1, %v251_v51 }
 0x26f   :  { %3364 = vmatprep.mubr.msk.f32.mxu1 %vm5035_vm1, %v252_v52 }
 0x272   :  { %3365 = vmatmul.mubr.msk.f32.gmra.mrb[26].mxu1 %vm5035_vm1, %v253_v53  ;;  %v3017_v53 = vld [vmem:[%s5028_s3 + $0x12] ss:$0 sm:$0xff] }
 0x311   :  { %v3327_v54 = vpop.f32.mrb[0].mxu1 }
 0x312   :  { %v404_v55 = vpop.f32.mrb[1].mxu1  ;;  %v549_v61 = vmul.f32 %v3327_v54, %v3012_v58 }
 0x313   :  { %v548_v0 = vmul.f32 %v3012_v58, %v404_v55 }
 0x315   :  { %v3330_v56 = vpop.f32.mrb[2].mxu1 }
 0x316   :  { %v414_v57 = vpop.f32.mrb[3].mxu1  ;;  %v551_v5 = vmul.f32 %v3330_v56, %v3012_v58 }
 0x317   :  { %v550_v8 = vmul.f32 %v3012_v58, %v414_v57 }
 0x319   :  { %v3333_v60 = vpop.f32.mrb[4].mxu1 }
 0x31a   :  { %v562_v62 = vmul.f32 %v3333_v60, %v3013_v59  ;;  %v424_v63 = vpop.f32.mrb[5].mxu1 }
 0x31b   :  { %v561_v1 = vmul.f32 %v3013_v59, %v424_v63 }
 0x31c   :  { %v566_v2 = vadd.f32 %v562_v62, %v549_v61 }
 0x31d   :  { %v565_v3 = vadd.f32 %v561_v1, %v548_v0  ;;  %v3336_v4 = vpop.f32.mrb[6].mxu1 }
 0x31e   :  { %v564_v6 = vmul.f32 %v3336_v4, %v3013_v59  ;;  %v434_v7 = vpop.f32.mrb[7].mxu1 }
 0x31f   :  { %v563_v9 = vmul.f32 %v3013_v59, %v434_v7 }
 0x320   :  { %v568_v11 = vadd.f32 %v564_v6, %v551_v5 }
 0x321   :  { %v567_v12 = vadd.f32 %v563_v9, %v550_v8  ;;  %v3339_v13 = vpop.f32.mrb[8].mxu1  ;;  %v3019_v9 = vld [vmem:[%s5028_s3 + $0x3] ss:$0 sm:$0xff] }
 0x322   :  { %v575_v14 = vmul.f32 %v3339_v13, %v3014_v10  ;;  %v444_v15 = vpop.f32.mrb[9].mxu1 }
 0x323   :  { %v574_v16 = vmul.f32 %v3014_v10, %v444_v15 }
 0x324   :  { %v579_v17 = vadd.f32 %v575_v14, %v566_v2  ;;  %v3018_v2 = vld [vmem:[%s5028_s3 + $0x13] ss:$0 sm:$0xff] }
 0x325   :  { %v578_v20 = vadd.f32 %v574_v16, %v565_v3  ;;  %v3342_v21 = vpop.f32.mrb[10].mxu1 }
 0x326   :  { %v577_v22 = vmul.f32 %v3342_v21, %v3014_v10  ;;  %v454_v23 = vpop.f32.mrb[11].mxu1 }
 0x327   :  { %v576_v26 = vmul.f32 %v3014_v10, %v454_v23 }
 0x328   :  { %v581_v28 = vadd.f32 %v577_v22, %v568_v11 }
 0x329   :  { %v580_v29 = vadd.f32 %v576_v26, %v567_v12  ;;  %v3345_v30 = vpop.f32.mrb[12].mxu1 }
 0x32a   :  { %v588_v31 = vmul.f32 %v3345_v30, %v3015_v27  ;;  %v464_v32 = vpop.f32.mrb[13].mxu1 }
 0x32b   :  { %v587_v33 = vmul.f32 %v3015_v27, %v464_v32 }
 0x32c   :  { %v592_v34 = vadd.f32 %v588_v31, %v579_v17 }
 0x32d   :  { %v591_v35 = vadd.f32 %v587_v33, %v578_v20  ;;  %v3348_v36 = vpop.f32.mrb[14].mxu1 }
 0x32e   :  { %v590_v37 = vmul.f32 %v3348_v36, %v3015_v27  ;;  %v474_v38 = vpop.f32.mrb[15].mxu1 }
 0x32f   :  { %v589_v39 = vmul.f32 %v3015_v27, %v474_v38 }
 0x330   :  { %v594_v41 = vadd.f32 %v590_v37, %v581_v28 }
 0x331   :  { %v593_v42 = vadd.f32 %v589_v39, %v580_v29  ;;  %v3351_v43 = vpop.f32.mrb[16].mxu1 }
 0x332   :  { %v601_v44 = vmul.f32 %v3351_v43, %v3016_v40  ;;  %v484_v45 = vpop.f32.mrb[17].mxu1 }
 0x333   :  { %v600_v46 = vmul.f32 %v3016_v40, %v484_v45 }
 0x334   :  { %v605_v47 = vadd.f32 %v601_v44, %v592_v34 }
 0x335   :  { %v604_v48 = vadd.f32 %v600_v46, %v591_v35  ;;  %v3354_v49 = vpop.f32.mrb[18].mxu1 }
 0x336   :  { %v603_v50 = vmul.f32 %v3354_v49, %v3016_v40  ;;  %v494_v51 = vpop.f32.mrb[19].mxu1 }
 0x337   :  { %v602_v52 = vmul.f32 %v3016_v40, %v494_v51  ;;  %v714_v51 = vld [vmem:[%s5029_s4 + $0x8] sm:$0xff] }
 0x338   :  { %v607_v54 = vadd.f32 %v603_v50, %v594_v41  ;;  %v713_v50 = vld [vmem:[%s5029_s4] sm:$0xff] }
 0x339   :  { %v606_v55 = vadd.f32 %v602_v52, %v593_v42  ;;  %v3357_v56 = vpop.f32.mrb[20].mxu1  ;;  %v3467_v52 = vpack.c.bf16 %v714_v51, %v713_v50 }
 0x33a   :  { %v614_v57 = vmul.f32 %v3357_v56, %v3017_v53  ;;  %v504_v58 = vpop.f32.mrb[21].mxu1 }
 0x33b   :  { %v613_v59 = vmul.f32 %v3017_v53, %v504_v58  ;;  %3468 = vmatprep.subr.bf16.mxu0 %v3467_v52 }
 0x33c   :  { %v618_v60 = vadd.f32 %v614_v57, %v605_v47  ;;  %3470 = vmatpush3.bf16.msra.mxu0 %v3467_v52 }
 0x33d   :  { %v617_v61 = vadd.f32 %v613_v59, %v604_v48  ;;  %v3360_v62 = vpop.f32.mrb[22].mxu1 }
 0x33e   :  { %v616_v63 = vmul.f32 %v3360_v62, %v3017_v53  ;;  %v514_v0 = vpop.f32.mrb[23].mxu1 }
 0x33f   :  { %v615_v1 = vmul.f32 %v3017_v53, %v514_v0  ;;  %v715_v53 = vld [vmem:[%s5029_s4 + $0x10] sm:$0xff] }
 0x340   :  { %v620_v3 = vadd.f32 %v616_v63, %v607_v54  ;;  %v716_v54 = vld [vmem:[%s5029_s4 + $0x18] sm:$0xff] }
 0x341   :  { %v619_v4 = vadd.f32 %v615_v1, %v606_v55  ;;  %v3363_v5 = vpop.f32.mrb[24].mxu1  ;;  %v3471_v55 = vpack.c.bf16 %v716_v54, %v715_v53 }
 0x342   :  { %v627_v6 = vmul.f32 %v3363_v5, %v3018_v2  ;;  %v524_v7 = vpop.f32.mrb[25].mxu1  ;;  %v3020_v5 = vld [vmem:[%s5028_s3 + $0x4] ss:$0 sm:$0xff] }
 0x343   :  { %v626_v8 = vmul.f32 %v3018_v2, %v524_v7  ;;  %3472 = vmatprep.subr.bf16.mxu0 %v3471_v55 }
 0x344   :  { %v631_v10 = vadd.f32 %v627_v6, %v618_v60  ;;  %3474 = vmatpush3.bf16.msra.mxu0 %v3471_v55 }
 0x345   :  { %v630_v11 = vadd.f32 %v626_v8, %v617_v61  ;;  %v3366_v12 = vpop.f32.mrb[26].mxu1 }
 0x346   :  { %v629_v13 = vmul.f32 %v3366_v12, %v3018_v2  ;;  %v534_v14 = vpop.f32.mrb[27].mxu1  ;;  %v640_v15 = vadd.f32 %v3019_v9, %v631_v10 }
 0x347   :  { %v628_v16 = vmul.f32 %v3018_v2, %v534_v14  ;;  %v639_v17 = vadd.f32 %v3019_v9, %v630_v11 }
 0x348   :  { %v633_v20 = vadd.f32 %v629_v13, %v620_v3  ;;  %v648_v21 = vsel %vm5035_vm1, %v640_v15, 0.0 }
 0x349   :  { %v632_v22 = vadd.f32 %v628_v16, %v619_v4  ;;  %649 = vadd.xlane.f32.xlu1 %v648_v21  ;;  %v645_v23 = vsel %vm5035_vm1, %v639_v17, 0.0 }
 0x34a   :  { %646 = vadd.xlane.f32.xlu0 %v645_v23  ;;  %v642_v26 = vadd.f32 %v3019_v9, %v633_v20 }
 0x34b   :  { %v641_v27 = vadd.f32 %v3019_v9, %v632_v22  ;;  %v3021_v9 = vld [vmem:[%s5028_s3 + $0x5] ss:$0 sm:$0xff] }
 0x34c   :  { %v654_v28 = vsel %vm5035_vm1, %v642_v26, 0.0 }
 0x34d   :  { %655 = vadd.xlane.f32.xlu1 %v654_v28  ;;  %v651_v29 = vsel %vm5035_vm1, %v641_v27, 0.0 }
 0x34e   :  { %652 = vadd.xlane.f32.xlu0 %v651_v29  ;;  %v857_v29 = vld [vmem:[%s5030_s5 + $0x10] sm:$0xff] }
 0x3d6   :  { %v650_v30 = vpop.xlane.xlu1 %649 }
 0x3d7   :  { %v658_v31 = vmul.f32 0.03125, %v650_v30  ;;  %v647_v32 = vpop.xlane.xlu0 %646  ;;  %v858_v30 = vld [vmem:[%s5030_s5 + $0x18] sm:$0xff] }
 0x3d8   :  { %v657_v33 = vmul.f32 0.03125, %v647_v32  ;;  %v859_v32 = vld [vmem:[%s5030_s5 + $0x20] sm:$0xff] }
 0x3d9   :  { %v662_v34 = vsub.f32 %v640_v15, %v658_v31  ;;  %v3479_v31 = vpack.c.bf16 %v858_v30, %v857_v29 }
 0x3da   :  { %v661_v35 = vsub.f32 %v639_v17, %v657_v33  ;;  %v656_v36 = vpop.xlane.xlu1 %655  ;;  %v860_v33 = vld [vmem:[%s5030_s5 + $0x28] sm:$0xff] }
 0x3db   :  { %v660_v37 = vmul.f32 0.03125, %v656_v36  ;;  %v653_v38 = vpop.xlane.xlu0 %652  ;;  %v666_v39 = vmul.f32 %v662_v34, %v662_v34  ;;  %v862_v36 = vld [vmem:[%s5030_s5 + $0x38] sm:$0xff] }
 0x3dc   :  { %v659_v40 = vmul.f32 0.03125, %v653_v38  ;;  %v665_v41 = vmul.f32 %v661_v35, %v661_v35  ;;  %v3022_v38 = vld [vmem:[%s5028_s3 + $0x6] ss:$0 sm:$0xff] }
 0x3dd   :  { %v664_v42 = vsub.f32 %v642_v26, %v660_v37  ;;  %v672_v43 = vsel %vm5035_vm1, %v666_v39, 0.0  ;;  %v855_v26 = vld [vmem:[%s5030_s5] sm:$0xff] }
 0x3de   :  { %v663_v44 = vsub.f32 %v641_v27, %v659_v40  ;;  %673 = vadd.xlane.f32.xlu1 %v672_v43  ;;  %v669_v45 = vsel %vm5035_vm1, %v665_v41, 0.0  ;;  %v856_v27 = vld [vmem:[%s5030_s5 + $0x8] sm:$0xff] }
 0x3df   :  { %670 = vadd.xlane.f32.xlu0 %v669_v45  ;;  %v668_v46 = vmul.f32 %v664_v42, %v664_v42  ;;  %v3475_v28 = vpack.c.bf16 %v856_v27, %v855_v26 }
 0x3e0   :  { %v667_v47 = vmul.f32 %v663_v44, %v663_v44 }
 0x3e1   :  { %v678_v48 = vsel %vm5035_vm1, %v668_v46, 0.0  ;;  %3476 = vmatprep.subr.bf16.mxu0 %v3475_v28 }
 0x3e2   :  { %679 = vadd.xlane.f32.xlu1 %v678_v48  ;;  %v675_v49 = vsel %vm5035_vm1, %v667_v47, 0.0 }
 0x3e3   :  { %676 = vadd.xlane.f32.xlu0 %v675_v49 }
 0x46b   :  { %v674_v56 = vpop.xlane.xlu1 %673 }
 0x46c   :  { %v682_v57 = vmul.f32 0.03125, %v674_v56  ;;  %v671_v58 = vpop.xlane.xlu0 %670 }
 0x46d   :  { %v681_v59 = vmul.f32 0.03125, %v671_v58 }
 0x46e   :  { %v686_v60 = vadd.f32 1e-06, %v682_v57 }
 0x46f   :  { %v685_v61 = vadd.f32 1e-06, %v681_v59  ;;  %v680_v62 = vpop.xlane.xlu1 %679 }
 0x470   :  { %3668 = vrsqrt.f32 %v686_v60  ;;  %v684_v63 = vmul.f32 0.03125, %v680_v62  ;;  %v677_v0 = vpop.xlane.xlu0 %676 }
 0x471   :  { %3670 = vrsqrt.f32 %v685_v61  ;;  %v683_v1 = vmul.f32 0.03125, %v677_v0 }
 0x472   :  { %v688_v2 = vadd.f32 1e-06, %v684_v63 }
 0x473   :  { %v687_v3 = vadd.f32 1e-06, %v683_v1 }
 0x474   :  { %3672 = vrsqrt.f32 %v688_v2 }
 0x475   :  { %3674 = vrsqrt.f32 %v687_v3 }
 0x47a   :  { %v3669_v4 = vpop.eup %3668 }
 0x47b   :  { %v3671_v6 = vpop.eup %3670  ;;  %v694_v7 = vmul.f32 %v3669_v4, %v662_v34  ;;  %v3483_v34 = vpack.c.bf16 %v860_v33, %v859_v32 }
 0x47c   :  { %v693_v8 = vmul.f32 %v3671_v6, %v661_v35  ;;  %v861_v35 = vld [vmem:[%s5030_s5 + $0x30] sm:$0xff] }
 0x47d   :  { %v702_v10 = vmul.f32 %v3020_v5, %v694_v7  ;;  %v3487_v37 = vpack.c.bf16 %v862_v36, %v861_v35 }
 0x47e   :  { %v3673_v11 = vpop.eup %3672  ;;  %v701_v12 = vmul.f32 %v3020_v5, %v693_v8 }
 0x47f   :  { %v3675_v13 = vpop.eup %3674  ;;  %v696_v14 = vmul.f32 %v3673_v11, %v664_v42  ;;  %v710_v17 = vadd.f32 %v3021_v9, %v702_v10 }
 0x480   :  { %v709_v15 = vadd.f32 %v3021_v9, %v701_v12  ;;  %v695_v16 = vmul.f32 %v3675_v13, %v663_v44 }
 0x481   :  { %v704_v20 = vmul.f32 %v3020_v5, %v696_v14 }
 0x482   :  { %3375 = vmatprep.mubr.msk.f32.mxu0 %vm5035_vm1, %v709_v15  ;;  %v703_v21 = vmul.f32 %v3020_v5, %v695_v16 }
 0x483   :  { %3376 = vmatmul.mubr.msk.f32.vlgmr.msra.gmra.mrb[4].mxu0 %vm5035_vm1, %v710_v17  ;;  %v712_v23 = vadd.f32 %v3021_v9, %v704_v20 }
 0x484   :  { %v711_v22 = vadd.f32 %v3021_v9, %v703_v21  ;;  %3478 = vmatpush3.bf16.msra.mxu0 %v3475_v28  ;;  %v3027_v21 = vld [vmem:[%s5028_s3 + $0x7] ss:$0 sm:$0xff] }
 0x485   :  { %3480 = vmatprep.subr.bf16.mxu0 %v3479_v31 }
 0x486   :  { %3378 = vmatprep.mubr.msk.f32.mxu0 %vm5035_vm1, %v711_v22 }
 0x487   :  { %3379 = vmatmul.mubr.msk.f32.gmra.mrb[6].mxu0 %vm5035_vm1, %v712_v23  ;;  %v3032_v23 = vld [vmem:[%s5028_s3 + $0x8] ss:$0 sm:$0xff] }
 0x488   :  { %3482 = vmatpush3.bf16.msra.mxu0 %v3479_v31 }
 0x489   :  { %3484 = vmatprep.subr.bf16.mxu0 %v3483_v34 }
 0x48c   :  { %3486 = vmatpush3.bf16.msra.mxu0 %v3483_v34 }
 0x48d   :  { %3488 = vmatprep.subr.bf16.mxu0 %v3487_v37 }
 0x490   :  { %3490 = vmatpush3.bf16.msra.mxu0 %v3487_v37 }
 0x556   :  { %v3377_v39 = vpop.f32.mrb[4].mxu0 }
 0x557   :  { %v806_v40 = vadd.f32 %v3377_v39, %v3022_v38  ;;  %v800_v41 = vpop.f32.mrb[5].mxu0 }
 0x558   :  { %v801_v42 = vadd.f32 %v3022_v38, %v800_v41 }
 0x559   :  { %v820_v43 = vmul.f32 %v806_v40, %v806_v40 }
 0x55a   :  { %v819_v44 = vmul.f32 %v801_v42, %v801_v42  ;;  %v3380_v45 = vpop.f32.mrb[6].mxu0 }
 0x55b   :  { %v824_v46 = vmul.f32 %v820_v43, %v806_v40  ;;  %v816_v47 = vadd.f32 %v3380_v45, %v3022_v38  ;;  %v810_v48 = vpop.f32.mrb[7].mxu0 }
 0x55c   :  { %v823_v49 = vmul.f32 %v819_v44, %v801_v42  ;;  %v811_v50 = vadd.f32 %v3022_v38, %v810_v48  ;;  %v1156_v44 = vld [vmem:[%s5031_s6 + $0x28] sm:$0xff] }
 0x55d   :  { %v828_v51 = vmul.f32 0.044715, %v824_v46  ;;  %v822_v52 = vmul.f32 %v816_v47, %v816_v47 }
 0x55e   :  { %v827_v53 = vmul.f32 0.044715, %v823_v49  ;;  %v821_v54 = vmul.f32 %v811_v50, %v811_v50 }
 0x55f   :  { %v832_v55 = vadd.f32 %v828_v51, %v806_v40  ;;  %v826_v56 = vmul.f32 %v822_v52, %v816_v47 }
 0x560   :  { %v831_v57 = vadd.f32 %v827_v53, %v801_v42  ;;  %v825_v58 = vmul.f32 %v821_v54, %v811_v50 }
 0x561   :  { %v836_v59 = vmul.f32 0.7978846, %v832_v55  ;;  %v830_v60 = vmul.f32 0.044715, %v826_v56 }
 0x562   :  { %v835_v61 = vmul.f32 0.7978846, %v831_v57  ;;  %v829_v62 = vmul.f32 0.044715, %v825_v58 }
 0x563   :  { %3676 = vtanh.f32 %v836_v59  ;;  %v834_v63 = vadd.f32 %v830_v60, %v816_v47 }
 0x564   :  { %3678 = vtanh.f32 %v835_v61  ;;  %v833_v0 = vadd.f32 %v829_v62, %v811_v50 }
 0x565   :  { %v838_v1 = vmul.f32 0.7978846, %v834_v63 }
 0x566   :  { %v837_v2 = vmul.f32 0.7978846, %v833_v0 }
 0x567   :  { %3680 = vtanh.f32 %v838_v1 }
 0x568   :  { %3682 = vtanh.f32 %v837_v2 }
 0x56d   :  { %v3677_v3 = vpop.eup %3676 }
 0x56e   :  { %v3679_v4 = vpop.eup %3678  ;;  %v844_v5 = vadd.f32 1.0, %v3677_v3  ;;  %v1049_v3 = vld [vmem:[%s5031_s6] sm:$0xff] }
 0x56f   :  { %v843_v6 = vadd.f32 1.0, %v3679_v4  ;;  %v1050_v4 = vld [vmem:[%s5031_s6 + $0x8] sm:$0xff] }
 0x570   :  { %v848_v7 = vmul.f32 0.5, %v844_v5  ;;  %v3491_v5 = vpack.c.bf16 %v1050_v4, %v1049_v3 }
 0x571   :  { %v3681_v8 = vpop.eup %3680  ;;  %v847_v9 = vmul.f32 0.5, %v843_v6  ;;  %v1051_v6 = vld [vmem:[%s5031_s6 + $0x10] sm:$0xff] }
 0x572   :  { %v3683_v10 = vpop.eup %3682  ;;  %v846_v11 = vadd.f32 1.0, %v3681_v8  ;;  %v852_v14 = vmul.f32 %v848_v7, %v806_v40  ;;  %v1052_v7 = vld [vmem:[%s5031_s6 + $0x18] sm:$0xff]  ;;  %3492 = vmatprep.subr.bf16.mxu0 %v3491_v5 }
 0x573   :  { %v851_v12 = vmul.f32 %v847_v9, %v801_v42  ;;  %v845_v13 = vadd.f32 1.0, %v3683_v10  ;;  %v3495_v8 = vpack.c.bf16 %v1052_v7, %v1051_v6 }
 0x574   :  { %v850_v15 = vmul.f32 0.5, %v846_v11 }
 0x575   :  { %3397 = vmatprep.mubr.msk.f32.mxu0 %vm868_vm2, %v851_v12  ;;  %v849_v16 = vmul.f32 0.5, %v845_v13 }
 0x576   :  { %3398 = vmatmul.mubr.msk.f32.vlgmr.msra.gmra.mrb[8].mxu0 %vm868_vm2, %v852_v14  ;;  %v854_v20 = vmul.f32 %v850_v15, %v816_v47 }
 0x577   :  { %v853_v17 = vmul.f32 %v849_v16, %v811_v50  ;;  %3494 = vmatpush3.bf16.msra.mxu0 %v3491_v5 }
 0x578   :  { %3496 = vmatprep.subr.bf16.mxu0 %v3495_v8 }
 0x579   :  { %3400 = vmatprep.mubr.msk.f32.mxu0 %vm868_vm2, %v853_v17 }
 0x57a   :  { %3401 = vmatmul.mubr.msk.f32.gmra.mrb[10].mxu0 %vm868_vm2, %v854_v20 }
 0x57b   :  { %3498 = vmatpush3.bf16.msra.mxu0 %v3495_v8 }
 0x649   :  { %v3399_v22 = vpop.f32.mrb[8].mxu0 }
 0x64a   :  { %v953_v26 = vadd.f32 %v3399_v22, %v3027_v21  ;;  %v947_v27 = vpop.f32.mrb[9].mxu0 }
 0x64b   :  { %v948_v28 = vadd.f32 %v3027_v21, %v947_v27 }
 0x64c   :  { %v972_v29 = vmul.f32 %v3032_v23, %v953_v26  ;;  %v3033_v26 = vld [vmem:[%s5028_s3 + $0x9] ss:$0 sm:$0xff] }
 0x64d   :  { %v971_v30 = vmul.f32 %v3032_v23, %v948_v28  ;;  %v3402_v31 = vpop.f32.mrb[10].mxu0 }
 0x64e   :  { %v963_v32 = vadd.f32 %v3402_v31, %v3027_v21  ;;  %v957_v33 = vpop.f32.mrb[11].mxu0  ;;  %v976_v34 = vadd.f32 %v972_v29, %v3880_v19 }
 0x64f   :  { %v958_v35 = vadd.f32 %v3027_v21, %v957_v33  ;;  %v975_v36 = vadd.f32 %v971_v30, %v3878_v18  ;;  %v1155_v18 = vld [vmem:[%s5031_s6 + $0x20] sm:$0xff]  ;;  %v3034_v30 = vld [vmem:[%s5028_s3 + $0xa] ss:$0 sm:$0xff] }
 0x650   :  { %v974_v37 = vmul.f32 %v3032_v23, %v963_v32  ;;  %v984_v38 = vsel %vm5035_vm1, %v976_v34, 0.0  ;;  %v3499_v45 = vpack.c.bf16 %v1156_v44, %v1155_v18  ;;  %v3082_v18 = vld [vmem:[%s5032_s7 + $0x68] sm:$0x1]  ;;  %v3080_v44 = vld [vmem:[%s5032_s7 + $0x58] sm:$0xff] }
 0x651   :  { %v973_v39 = vmul.f32 %v3032_v23, %v958_v35  ;;  %985 = vadd.xlane.f32.xlu1 %v984_v38  ;;  %v981_v40 = vsel %vm5035_vm1, %v975_v36, 0.0 }
 0x652   :  { %982 = vadd.xlane.f32.xlu0 %v981_v40  ;;  %v978_v41 = vadd.f32 %v974_v37, %v3886_v25  ;;  %v1157_v25 = vld [vmem:[%s5031_s6 + $0x30] sm:$0xff]  ;;  %3500 = vmatprep.subr.bf16.mxu1 %v3499_v45 }
 0x653   :  { %v977_v42 = vadd.f32 %v973_v39, %v3884_v24  ;;  %v1158_v24 = vld [vmem:[%s5031_s6 + $0x38] sm:$0xff]  ;;  %3502 = vmatpush3.bf16.msra.mxu1 %v3499_v45 }
 0x654   :  { %v990_v43 = vsel %vm5035_vm1, %v978_v41, 0.0  ;;  %v3503_v46 = vpack.c.bf16 %v1158_v24, %v1157_v25  ;;  %v3084_v24 = vld [vmem:[%s5032_s7 + $0x78] sm:$0x1] }
 0x655   :  { %991 = vadd.xlane.f32.xlu1 %v990_v43  ;;  %v987_v19 = vsel %vm5035_vm1, %v977_v42, 0.0  ;;  %v4138_v43 = vld [vmem:[%s5028_s3 + $0xc] ss:$0 sm:$0xff] }
 0x656   :  { %988 = vadd.xlane.f32.xlu0 %v987_v19  ;;  %3504 = vmatprep.subr.bf16.mxu1 %v3503_v46  ;;  %v3078_v19 = vld [vmem:[%s5032_s7 + $0x48] sm:$0xff] }
 0x657   :  { %3506 = vmatpush3.bf16.msra.mxu1 %v3503_v46  ;;  %v3507_v25 = vpack.c.bf16 %v3082_v18, %v3078_v19  ;;  %v3077_v46 = vld [vmem:[%s5032_s7 + $0x40] sm:$0xff]  ;;  %v3745_v18 = vmov 2102212464  }
 0x659   :  { %3509 = vmatprep.subr.msk.bf16.mxu0 %vm4149_vm5, %v3507_v25 }
 0x6de   :  { %v986_v47 = vpop.xlane.xlu1 %985 }
 0x6df   :  { %v994_v48 = vmul.f32 0.03125, %v986_v47  ;;  %v983_v49 = vpop.xlane.xlu0 %982 }
 0x6e0   :  { %v993_v50 = vmul.f32 0.03125, %v983_v49  ;;  %v3513_v49 = vpack.c.bf16 %v3084_v24, %v3080_v44  ;;  %v3746_v24 = vmov 920167782  }
 0x6e1   :  { %v998_v51 = vsub.f32 %v976_v34, %v994_v48 }
 0x6e2   :  { %v997_v52 = vsub.f32 %v975_v36, %v993_v50  ;;  %v992_v53 = vpop.xlane.xlu1 %991  ;;  %v3081_v50 = vld [vmem:[%s5032_s7 + $0x60] sm:$0x1]  ;;  %3515 = vmatprep.subr.msk.bf16.mxu1 %vm4149_vm5, %v3513_v49 }
 0x6e3   :  { %v996_v54 = vmul.f32 0.03125, %v992_v53  ;;  %v989_v55 = vpop.xlane.xlu0 %988  ;;  %v1002_v56 = vmul.f32 %v998_v51, %v998_v51  ;;  %v2098_v53 = vld [vmem:[%s5032_s7 + $0x8] sm:$0xff] }
 0x6e4   :  { %v995_v57 = vmul.f32 0.03125, %v989_v55  ;;  %v1001_v58 = vmul.f32 %v997_v52, %v997_v52 }
 0x6e5   :  { %v1000_v59 = vsub.f32 %v978_v41, %v996_v54  ;;  %v1008_v60 = vsel %vm5035_vm1, %v1002_v56, 0.0 }
 0x6e6   :  { %v999_v61 = vsub.f32 %v977_v42, %v995_v57  ;;  %1009 = vadd.xlane.f32.xlu1 %v1008_v60  ;;  %v1005_v62 = vsel %vm5035_vm1, %v1001_v58, 0.0  ;;  %v3510_v57 = vpack.c.bf16 %v3081_v50, %v3077_v46  ;;  %v3083_v58 = vld [vmem:[%s5032_s7 + $0x70] sm:$0x1] }
 0x6e7   :  { %1006 = vadd.xlane.f32.xlu0 %v1005_v62  ;;  %v1004_v63 = vmul.f32 %v1000_v59, %v1000_v59 }
 0x6e8   :  { %v1003_v0 = vmul.f32 %v999_v61, %v999_v61 }
 0x6e9   :  { %v1014_v1 = vsel %vm5035_vm1, %v1004_v63, 0.0  ;;  %v4191_v63 = vld [vmem:[%s5028_s3 + $0xb] ss:$0 sm:$0xff] }
 0x6ea   :  { %1015 = vadd.xlane.f32.xlu1 %v1014_v1  ;;  %v1011_v2 = vsel %vm5035_vm1, %v1003_v0, 0.0 }
 0x6eb   :  { %1012 = vadd.xlane.f32.xlu0 %v1011_v2 }
 0x773   :  { %v1010_v9 = vpop.xlane.xlu1 %1009 }
 0x774   :  { %v1018_v10 = vmul.f32 0.03125, %v1010_v9  ;;  %v1007_v11 = vpop.xlane.xlu0 %1006 }
 0x775   :  { %v1017_v12 = vmul.f32 0.03125, %v1007_v11 }
 0x776   :  { %v1022_v13 = vadd.f32 1e-06, %v1018_v10 }
 0x777   :  { %v1021_v14 = vadd.f32 1e-06, %v1017_v12  ;;  %v1016_v15 = vpop.xlane.xlu1 %1015 }
 0x778   :  { %3684 = vrsqrt.f32 %v1022_v13  ;;  %v1020_v16 = vmul.f32 0.03125, %v1016_v15  ;;  %v1013_v17 = vpop.xlane.xlu0 %1012 }
 0x779   :  { %3686 = vrsqrt.f32 %v1021_v14  ;;  %v1019_v20 = vmul.f32 0.03125, %v1013_v17 }
 0x77a   :  { %v1024_v21 = vadd.f32 1e-06, %v1020_v16 }
 0x77b   :  { %v1023_v22 = vadd.f32 1e-06, %v1019_v20 }
 0x77c   :  { %3688 = vrsqrt.f32 %v1024_v21 }
 0x77d   :  { %3690 = vrsqrt.f32 %v1023_v22 }
 0x782   :  { %v3685_v23 = vpop.eup %3684 }
 0x783   :  { %v3687_v27 = vpop.eup %3686  ;;  %v1030_v28 = vmul.f32 %v3685_v23, %v998_v51  ;;  %v3079_v51 = vld [vmem:[%s5032_s7 + $0x50] sm:$0xff] }
 0x784   :  { %v1029_v29 = vmul.f32 %v3687_v27, %v997_v52  ;;  %v3741_v52 = vmov 0.0  }
 0x785   :  { %v1038_v31 = vmul.f32 %v3033_v26, %v1030_v28 }
 0x786   :  { %v3689_v32 = vpop.eup %3688  ;;  %v1037_v33 = vmul.f32 %v3033_v26, %v1029_v29 }
 0x787   :  { %v3691_v34 = vpop.eup %3690  ;;  %v1032_v35 = vmul.f32 %v3689_v32, %v1000_v59  ;;  %v1046_v38 = vadd.f32 %v3034_v30, %v1038_v31  ;;  %v2102_v59 = vld [vmem:[%s5032_s7 + $0x28] sm:$0x1] }
 0x788   :  { %v1045_v36 = vadd.f32 %v3034_v30, %v1037_v33  ;;  %v1031_v37 = vmul.f32 %v3691_v34, %v999_v61  ;;  %v3516_v61 = vpack.c.bf16 %v3083_v58, %v3079_v51  ;;  %v3519_v62 = vpack.c.bf16 %v2102_v59, %v2098_v53 }
 0x789   :  { %v1040_v39 = vmul.f32 %v3033_v26, %v1032_v35  ;;  %v3742_v34 = vmov 683565275  }
 0x78a   :  { %3411 = vmatprep.mubr.msk.f32.mxu0 %vm5035_vm1, %v1045_v36  ;;  %3425 = vmatprep.mubr.msk.f32.mxu1 %vm5035_vm1, %v1045_v36  ;;  %v1039_v40 = vmul.f32 %v3033_v26, %v1031_v37  ;;  %v3743_v36 = vmov 2475754826  }
 0x78b   :  { %3412 = vmatmul.mubr.msk.f32.vlgmr.msra.gmra.mrb[12].mxu0 %vm5035_vm1, %v1046_v38  ;;  %3426 = vmatmul.mubr.msk.f32.vlgmr.msra.gmra.mrb[28].mxu1 %vm5035_vm1, %v1046_v38  ;;  %v1048_v42 = vadd.f32 %v3034_v30, %v1040_v39 }
 0x78c   :  { %v1047_v41 = vadd.f32 %v3034_v30, %v1039_v40  ;;  %3512 = vmatpush1.bf16.msk.msra.mxu0 %vm4149_vm5, %v3510_v57  ;;  %3518 = vmatpush1.bf16.msk.msra.mxu1 %vm4149_vm5, %v3516_v61 }
 0x78d   :  { %3521 = vmatprep.subr.msk.bf16.mxu0 %vm4149_vm5, %v3519_v62 }
 0x78e   :  { %3414 = vmatprep.mubr.msk.f32.mxu0 %vm5035_vm1, %v1047_v41  ;;  %3428 = vmatprep.mubr.msk.f32.mxu1 %vm5035_vm1, %v1047_v41  ;;  %v3744_v41 = vmov 2131351028  }
 0x78f   :  { %3415 = vmatmul.mubr.msk.f32.gmra.mrb[14].mxu0 %vm5035_vm1, %v1048_v42  ;;  %3429 = vmatmul.mubr.msk.f32.gmra.mrb[30].mxu1 %vm5035_vm1, %v1048_v42 }
 0x790   :  { %2204 = vmatprep.mubr.f32.mxu0 %v3741_v52  ;;  %2293 = vmatprep.mubr.f32.mxu1 %v3741_v52 }
 0x85e   :  { %v3413_v47 = vpop.f32.mrb[12].mxu0  ;;  %v3427_v48 = vpop.f32.mrb[28].mxu1 }
 0x85f   :  { %v4171_v54 = vadd.f32 %v3427_v48, %v4138_v43  ;;  %v4173_v55 = vpop.f32.mrb[13].mxu0  ;;  %v1230_v56 = vpop.f32.mrb[29].mxu1  ;;  %v1142_v6 = vadd.f32 %v3413_v47, %v4191_v63  ;;  %v3747_v48 = vmov 1326507024  }
 0x860   :  { %v4184_v60 = vadd.f32 %v4138_v43, %v1230_v56 }
 0x861   :  { %v1364_v0 = vand.u32 2147483647, %v4171_v54  ;;  %v1367_v1 = vand.u32 2139095040, %v4171_v54  ;;  %v1251_v17 = vmul.f32 1.442695, %v1142_v6  ;;  %vm1366_vm2 = vcmp.lt.s32.totalorder %v4171_v54, 0 }
 0x862   :  { %v1261_v2 = vand.u32 2147483647, %v4184_v60  ;;  %v1264_v3 = vand.u32 2139095040, %v4184_v60  ;;  %v4203_v5 = vpop.f32.mrb[14].mxu0  ;;  %v3430_v9 = vpop.f32.mrb[30].mxu1 }
 0x863   :  { %v1368_v4 = vshrl.u32 %v1367_v1, 23  ;;  %v1371_v7 = vand.u32 8388607, %v1364_v0  ;;  %v4210_v12 = vpop.f32.mrb[15].mxu0  ;;  %v4212_v13 = vpop.f32.mrb[31].mxu1  ;;  %v4215_v15 = vadd.f32 %v3430_v9, %v4138_v43  ;;  %3692 = vpow2.f32 %v1251_v17 }
 0x864   :  { %v1265_v8 = vshrl.u32 %v1264_v3, 23  ;;  %v1268_v11 = vand.u32 8388607, %v1261_v2 }
 0x865   :  { %v3049_v10 = vadd.s32 4294967169, %v1368_v4  ;;  %v1372_v20 = vor.u32 8388608, %v1371_v7  ;;  %v1573_v26 = vand.u32 2139095040, %v4215_v15  ;;  %v1570_v33 = vand.u32 2147483647, %v4215_v15 }
 0x866   :  { %v3045_v14 = vadd.s32 4294967169, %v1265_v8  ;;  %v1269_v22 = vor.u32 8388608, %v1268_v11 }
 0x867   :  { %v1374_v16 = vadd.s32 1, %v3049_v10  ;;  %v4218_v29 = vshll.u32 %v1372_v20, 8  ;;  %v4225_v39 = vshrl.u32 %v1573_v26, 23 }
 0x868   :  { %v1271_v21 = vadd.s32 1, %v3045_v14  ;;  %v4220_v32 = vshll.u32 %v1269_v22, 8 }
 0x869   :  { %vm1375_vm6 = vcmp.gt.s32.totalorder %v1374_v16, 0 }
 0x86a   :  { %v1376_v23 = vsel %vm1375_vm6, %v1374_v16, 0  ;;  %vm1272_vm7 = vcmp.gt.s32.totalorder %v1271_v21, 0  ;;  %vm1263_vm6 = vcmp.lt.s32.totalorder %v4184_v60, 0 }
 0x86b   :  { %v1378_v27 = vand.u32 31, %v1376_v23  ;;  %v1273_v28 = vsel %vm1272_vm7, %v1271_v21, 0  ;;  %v1377_v30 = vshrl.u32 %v1376_v23, 5  ;;  %vm4303_vm7 = vcmp.le.f32.partialorder %v1364_v0, 0.7853982 }
 0x86c   :  { %v1275_v38 = vand.u32 31, %v1273_v28 }
 0x86d   :  { %v1379_v31 = vsub.s32 32, %v1378_v27  ;;  %v1381_v35 = vshll.u32 %v3742_v34, %v1378_v27  ;;  %v1384_v37 = vshll.u32 %v3743_v36, %v1378_v27  ;;  %v1387_v19 = vshll.u32 %v3744_v41, %v1378_v27  ;;  %v4236_v10 = vpop.eup %3692 }
 0x86e   :  { %v1390_v25 = vshll.u32 %v3745_v18, %v1378_v27  ;;  %v1393_v47 = vshll.u32 %v3746_v24, %v1378_v27  ;;  %vm1396_vm8 = vcmp.lt.s32.totalorder %v1377_v30, 1  ;;  %vm1399_vm9 = vcmp.lt.s32.totalorder %v1377_v30, 4 }
 0x86f   :  { %v1382_v40 = vshrl.u32 %v3743_v36, %v1379_v31  ;;  %v1385_v42 = vshrl.u32 %v3744_v41, %v1379_v31  ;;  %v1388_v44 = vshrl.u32 %v3745_v18, %v1379_v31  ;;  %v1391_v46 = vshrl.u32 %v3746_v24, %v1379_v31 }
 0x870   :  { %v1394_v49 = vshrl.u32 %v3747_v48, %v1379_v31  ;;  %v1276_v58 = vsub.s32 32, %v1275_v38  ;;  %v1380_v59 = vshrl.u32 %v3742_v34, %v1379_v31  ;;  %vm1397_vm10 = vcmp.lt.s32.totalorder %v1377_v30, 2 }
 0x871   :  { %v1383_v50 = vor.u32 %v1382_v40, %v1381_v35  ;;  %v1386_v51 = vor.u32 %v1385_v42, %v1384_v37  ;;  %v1389_v53 = vor.u32 %v1388_v44, %v1387_v19  ;;  %v1392_v56 = vor.u32 %v1391_v46, %v1390_v25 }
 0x872   :  { %v1395_v57 = vor.u32 %v1394_v49, %v1393_v47  ;;  %vm1398_vm11 = vcmp.lt.s32.totalorder %v1377_v30, 3  ;;  %v1278_v16 = vshll.u32 %v3742_v34, %v1275_v38  ;;  %v1279_v17 = vshrl.u32 %v3743_v36, %v1276_v58 }
 0x873   :  { %v1401_v61 = vsel %vm1399_vm9, %v1389_v53, 2102212464  ;;  %v1404_v62 = vsel %vm1396_vm8, %v1383_v50, %v1386_v51  ;;  %v1408_v1 = vsel %vm1396_vm8, %v1386_v51, %v1389_v53  ;;  %v1405_v3 = vsel %vm1399_vm9, %v1392_v56, 920167782 }
 0x874   :  { %v1409_v4 = vsel %vm1399_vm9, %v1395_v57, 1326507024  ;;  %v1400_v6 = vsel %vm1396_vm8, %v1380_v59, %v1383_v50  ;;  %v1402_v7 = vsel %vm1398_vm11, %v1386_v51, %v1401_v61  ;;  %v1406_v8 = vsel %vm1398_vm11, %v1389_v53, %v1405_v3 }
 0x875   :  { %v1410_v9 = vsel %vm1398_vm11, %v1392_v56, %v1409_v4  ;;  %v1407_v11 = vsel %vm1397_vm10, %v1404_v62, %v1406_v8  ;;  %v1403_v26 = vsel %vm1397_vm10, %v1400_v6, %v1402_v7  ;;  %v1274_v27 = vshrl.u32 %v1273_v28, 5 }
 0x876   :  { %v1411_v14 = vsel %vm1397_vm10, %v1408_v1, %v1410_v9  ;;  %v4245_v22 = vmul.u32.u64.low %v4218_v29, %v1407_v11  ;;  %v4246_v23 = vmul.u32.u64.high %v4218_v29, %v1407_v11, %v4245_v22  ;;  %v1281_v30 = vshll.u32 %v3743_v36, %v1275_v38 }
 0x877   :  { %v4241_v20 = vmul.u32.u64.low %v4218_v29, %v1411_v14  ;;  %v4242_v21 = vmul.u32.u64.high %v4218_v29, %v1411_v14, %v4241_v20  ;;  %v1282_v31 = vshrl.u32 %v3744_v41, %v1276_v58  ;;  %v1280_v35 = vor.u32 %v1279_v17, %v1278_v16 }
 0x878   :  { %v1284_v37 = vshll.u32 %v3744_v41, %v1275_v38  ;;  %v1285_v40 = vshrl.u32 %v3745_v18, %v1276_v58  ;;  %v1288_v42 = vshrl.u32 %v3746_v24, %v1276_v58  ;;  %v1287_v44 = vshll.u32 %v3745_v18, %v1275_v38 }
 0x879   :  { %v1283_v19 = vor.u32 %v1282_v31, %v1281_v30  ;;  %v1290_v25 = vshll.u32 %v3746_v24, %v1275_v38  ;;  %v1291_v46 = vshrl.u32 %v3747_v48, %v1276_v58  ;;  %v1419_v28 = vmul.u32 %v4218_v29, %v1403_v26 }
 0x87a   :  { %vm1421_vm12 = vc.u32 %v4242_v21, %v4245_v22  ;;  %v1422_v47 = vadd.s32 1, %v4246_v23  ;;  %v1286_v49 = vor.u32 %v1285_v40, %v1284_v37  ;;  %v1289_v50 = vor.u32 %v1288_v42, %v1287_v44  ;;  %v2104_v42 = vld [vmem:[%s5032_s7 + $0x38] sm:$0x1] }
 0x87b   :  { %v1292_v51 = vor.u32 %v1291_v46, %v1290_v25  ;;  %vm1293_vm13 = vcmp.lt.s32.totalorder %v1274_v27, 1  ;;  %vm1296_vm14 = vcmp.lt.s32.totalorder %v1274_v27, 4  ;;  %v1277_v56 = vshrl.u32 %v3742_v34, %v1276_v58 }
 0x87c   :  { %v1423_v53 = vsel %vm1421_vm12, %v1422_v47, %v4246_v23  ;;  %v1298_v57 = vsel %vm1296_vm14, %v1286_v49, 2102212464  ;;  %v1301_v38 = vsel %vm1293_vm13, %v1280_v35, %v1283_v19  ;;  %vm1295_vm15 = vcmp.lt.s32.totalorder %v1274_v27, 3 }
 0x87d   :  { %v1424_v59 = vadd.s32 %v1423_v53, %v1419_v28  ;;  %v1302_v61 = vsel %vm1296_vm14, %v1289_v50, 920167782  ;;  %v1305_v29 = vsel %vm1293_vm13, %v1283_v19, %v1286_v49  ;;  %vm1294_vm0 = vcmp.lt.s32.totalorder %v1274_v27, 2 }
 0x87e   :  { %v1297_v62 = vsel %vm1293_vm13, %v1277_v56, %v1280_v35  ;;  %v1303_v1 = vsel %vm1295_vm15, %v1286_v49, %v1302_v61  ;;  %v1306_v3 = vsel %vm1296_vm14, %v1292_v51, 1326507024  ;;  %v1299_v6 = vsel %vm1295_vm15, %v1283_v19, %v1298_v57 }
 0x87f   :  { %v1425_v4 = vadd.s32 536870912, %v1424_v59  ;;  %v1304_v7 = vsel %vm1294_vm0, %v1301_v38, %v1303_v1  ;;  %v1307_v8 = vsel %vm1295_vm15, %v1289_v50, %v1306_v3  ;;  %v3057_v58 = vadd.s32 4294967169, %v4225_v39 }
 0x880   :  { %v1308_v9 = vsel %vm1294_vm0, %v1305_v29, %v1307_v8  ;;  %v4264_v11 = vmul.u32.u64.low %v4220_v32, %v1304_v7  ;;  %v4265_v14 = vmul.u32.u64.high %v4220_v32, %v1304_v7, %v4264_v11  ;;  %v4274_v23 = vadd.f32 %v4138_v43, %v4212_v13  ;;  %v2100_v13 = vld [vmem:[%s5032_s7 + $0x18] sm:$0xff] }
 0x881   :  { %v1426_v16 = vshrl.u32 %v1425_v4, 30  ;;  %v4269_v17 = vmul.u32.u64.low %v4220_v32, %v1308_v9  ;;  %v4270_v20 = vmul.u32.u64.high %v4220_v32, %v1308_v9, %v4269_v17  ;;  %v1137_v26 = vadd.f32 %v4191_v63, %v4173_v55 }
 0x882   :  { %v1300_v27 = vsel %vm1294_vm0, %v1297_v62, %v1299_v6  ;;  %v1577_v30 = vand.u32 8388607, %v1570_v33  ;;  %v1580_v31 = vadd.s32 1, %v3057_v58  ;;  %v1319_v37 = vadd.s32 1, %v4265_v14 }
 0x883   :  { %v1427_v35 = vshll.u32 %v1426_v16, 30  ;;  %v1450_v39 = vsub.s32 4, %v1426_v16  ;;  %v1316_v43 = vmul.u32 %v4220_v32, %v1300_v27  ;;  %vm1318_vm4 = vc.u32 %v4270_v20, %v4264_v11 }
 0x884   :  { %vm1581_vm3 = vcmp.gt.s32.totalorder %v1580_v31, 0  ;;  %v1470_v55 = vand.u32 2139095040, %v4274_v23  ;;  %v1249_v19 = vmul.f32 1.442695, %v1137_v26  ;;  %v1320_v44 = vsel %vm1318_vm4, %v1319_v37, %v4265_v14 }
 0x885   :  { %v4282_v40 = vsub.s32 %v1424_v59, %v1427_v35  ;;  %v1578_v25 = vor.u32 8388608, %v1577_v30  ;;  %v1582_v46 = vsel %vm1581_vm3, %v1580_v31, 0  ;;  %v1321_v32 = vadd.s32 %v1320_v44, %v1316_v43 }
 0x886   :  { %v1584_v47 = vand.u32 31, %v1582_v46  ;;  %v1467_v49 = vand.u32 2147483647, %v4274_v23  ;;  %v1451_v50 = vsel %vm1366_vm2, %v1450_v39, %v1426_v16  ;;  %v3525_v51 = vpack.c.bf16 %v2104_v42, %v2100_v13 }
 0x887   :  { %v1430_v28 = vsub.s32 0, %v4282_v40  ;;  %v1322_v56 = vadd.s32 536870912, %v1321_v32  ;;  %v1471_v38 = vshrl.u32 %v1470_v55, 23  ;;  %v1258_v59 = vmin.f32 %v4236_v10, 100.0 }
 0x888   :  { %v1585_v57 = vsub.s32 32, %v1584_v47  ;;  %v1420_v29 = vadd.s32 %v4245_v22, %v4242_v21  ;;  %3694 = vpow2.f32 %v1249_v19  ;;  %3527 = vmatprep.subr.msk.bf16.mxu1 %vm4149_vm5, %v3525_v51  ;;  %v4311_v3 = vshll.u32 %v1578_v25, 8 }
 0x889   :  { %v3050_v53 = vmin.u32 %v1430_v28, %v4282_v40  ;;  %v1323_v1 = vshrl.u32 %v1322_v56, 30  ;;  %v4315_v4 = vand.u32 8388607, %v1467_v49  ;;  %v4319_v0 = vsel %vm4303_vm7, 0, %v1451_v50 }
 0x88a   :  { %v4322_v6 = vadd.s32 %v4264_v11, %v4270_v20  ;;  %v4324_v21 = vshrl.u32 %v1582_v46, 5  ;;  %v1594_v22 = vshrl.u32 %v3745_v18, %v1585_v57  ;;  %vm4329_vm8 = vcmp.le.f32.partialorder %v1261_v2, 0.7853982 }
 0x88b   :  { %v1432_v62 = vclz %v3050_v53  ;;  %v1324_v9 = vshll.u32 %v1323_v1, 30  ;;  %v1587_v14 = vshll.u32 %v3742_v34, %v1584_v47  ;;  %v3053_v58 = vadd.s32 4294967169, %v1471_v38 }
 0x88c   :  { %v1347_v16 = vsub.s32 4, %v1323_v1  ;;  %v1588_v17 = vshrl.u32 %v3743_v36, %v1585_v57  ;;  %v1591_v11 = vshrl.u32 %v3744_v41, %v1585_v57  ;;  %v1593_v20 = vshll.u32 %v3744_v41, %v1584_v47 }
 0x88d   :  { %v3051_v7 = vadd.s32 4294967294, %v1432_v62  ;;  %v4337_v26 = vsub.s32 %v1321_v32, %v1324_v9  ;;  %v1590_v27 = vshll.u32 %v3743_v36, %v1584_v47  ;;  %v1596_v2 = vshll.u32 %v3745_v18, %v1584_v47 }
 0x88e   :  { %v1595_v31 = vor.u32 %v1594_v22, %v1593_v20  ;;  %v1597_v35 = vshrl.u32 %v3746_v24, %v1585_v57  ;;  %v1600_v39 = vshrl.u32 %v3747_v48, %v1585_v57  ;;  %v1599_v13 = vshll.u32 %v3746_v24, %v1584_v47 }
 0x88f   :  { %vm3052_vm9 = vcmp.lt.s32.totalorder %v3051_v7, 0  ;;  %v1327_v55 = vsub.s32 0, %v4337_v26  ;;  %v1348_v19 = vsel %vm1263_vm6, %v1347_v16, %v1323_v1  ;;  %v1589_v44 = vor.u32 %v1588_v17, %v1587_v14 }
 0x890   :  { %v1435_v30 = vsel %vm3052_vm9, 0, %v3051_v7  ;;  %v1592_v25 = vor.u32 %v1591_v11, %v1590_v27  ;;  %vm1605_vm10 = vcmp.lt.s32.totalorder %v4324_v21, 4  ;;  %v1586_v51 = vshrl.u32 %v3742_v34, %v1585_v57 }
 0x891   :  { %v1436_v37 = vsub.s32 32, %v1435_v30  ;;  %v1440_v43 = vsub.s32 4294967266, %v1435_v30  ;;  %v1437_v42 = vshll.u32 %v4282_v40, %v1435_v30  ;;  %v3046_v32 = vmin.u32 %v1327_v55, %v4337_v26 }
 0x892   :  { %v4350_v50 = vpop.eup %3694  ;;  %v1598_v53 = vor.u32 %v1597_v35, %v1596_v2  ;;  %v1601_v56 = vor.u32 %v1600_v39, %v1599_v13  ;;  %v1607_v40 = vsel %vm1605_vm10, %v1595_v31, 2102212464  ;;  %vm1602_vm11 = vcmp.lt.s32.totalorder %v4324_v21, 1 }
 0x893   :  { %v1438_v46 = vshrl.u32 %v1420_v29, %v1436_v37  ;;  %v1441_v28 = vadd.s32 127, %v1440_v43  ;;  %v1329_v62 = vclz %v3046_v32  ;;  %v1350_v29 = vsel %vm4329_vm8, 0, %v1348_v19 }
 0x894   :  { %vm1603_vm12 = vcmp.lt.s32.totalorder %v4324_v21, 2  ;;  %vm1604_vm13 = vcmp.lt.s32.totalorder %v4324_v21, 3  ;;  %v1606_v1 = vsel %vm1602_vm11, %v1586_v51, %v1589_v44  ;;  %v1610_v9 = vsel %vm1602_vm11, %v1589_v44, %v1592_v25 }
 0x895   :  { %v1439_v47 = vor.u32 %v1438_v46, %v1437_v42  ;;  %v1442_v38 = vshll.u32 %v1441_v28, 23  ;;  %v3047_v57 = vadd.s32 4294967294, %v1329_v62  ;;  %v1608_v7 = vsel %vm1604_vm13, %v1592_v25, %v1607_v40 }
 0x896   :  { %v1611_v16 = vsel %vm1605_vm10, %v1598_v53, 920167782  ;;  %v1614_v17 = vsel %vm1602_vm11, %v1592_v25, %v1595_v31  ;;  %v1615_v11 = vsel %vm1605_vm10, %v1601_v56, 1326507024  ;;  %v1477_v37 = vadd.s32 1, %v3053_v58 }
 0x897   :  { %v1443_v22 = vor.u32 4788187, %v1442_v38  ;;  %v1446_v14 = vcvt.s32.f32 %v1439_v47  ;;  %vm3048_vm14 = vcmp.lt.s32.totalorder %v3047_v57, 0  ;;  %v1612_v27 = vsel %vm1604_vm13, %v1595_v31, %v1611_v16 }
 0x898   :  { %v1616_v2 = vsel %vm1604_vm13, %v1598_v53, %v1615_v11  ;;  %v1332_v30 = vsel %vm3048_vm14, 0, %v3047_v57  ;;  %v1613_v35 = vsel %vm1603_vm12, %v1610_v9, %v1612_v27  ;;  %vm1478_vm15 = vcmp.gt.s32.totalorder %v1477_v37, 0 }
 0x899   :  { %v1444_v20 = vand.u32 2147483647, %v1443_v22  ;;  %v1617_v39 = vsel %vm1603_vm12, %v1614_v17, %v1616_v2  ;;  %v1333_v55 = vsub.s32 32, %v1332_v30  ;;  %v1334_v13 = vshll.u32 %v4337_v26, %v1332_v30 }
 0x89a   :  { %v1337_v42 = vsub.s32 4294967266, %v1332_v30  ;;  %v4370_v19 = vmul.u32.u64.low %v4311_v3, %v1617_v39  ;;  %v4371_v44 = vmul.u32.u64.high %v4311_v3, %v1617_v39, %v4370_v19  ;;  %v1257_v58 = vmin.f32 %v4350_v50, 100.0 }
 0x89b   :  { %v1447_v43 = vmul.f32 %v1446_v14, %v1444_v20  ;;  %v4374_v31 = vmul.u32.u64.low %v4311_v3, %v1613_v35  ;;  %v4375_v25 = vmul.u32.u64.high %v4311_v3, %v1613_v35, %v4374_v31  ;;  %v1335_v28 = vshrl.u32 %v4322_v6, %v1333_v55 }
 0x89c   :  { %v1338_v32 = vadd.s32 127, %v1337_v42  ;;  %v1609_v26 = vsel %vm1603_vm12, %v1606_v1, %v1608_v7  ;;  %v1475_v51 = vor.u32 8388608, %v4315_v4  ;;  %v1479_v53 = vsel %vm1478_vm15, %v1477_v37, 0 }
 0x89d   :  { %v1448_v46 = vxor.u32 2147483648, %v1447_v43  ;;  %v1336_v40 = vor.u32 %v1335_v28, %v1334_v13  ;;  %v1874_v38 = vadd.s32 3, %v4319_v0  ;;  %v4389_v62 = vand.u32 3, %v1350_v29 }
 0x89e   :  { %v1339_v47 = vshll.u32 %v1338_v32, 23  ;;  %vm1627_vm0 = vc.u32 %v4371_v44, %v4374_v31  ;;  %v1628_v21 = vadd.s32 1, %v4375_v25  ;;  %v1625_v1 = vmul.u32 %v4311_v3, %v1609_v26 }
 0x89f   :  { %v1449_v56 = vsel %vm1366_vm2, %v1448_v46, %v1447_v43  ;;  %v1481_v22 = vand.u32 31, %v1479_v53  ;;  %v1770_v57 = vadd.s32 3, %v1350_v29  ;;  %v4396_v9 = vshll.u32 %v1475_v51, 8 }
 0x8a0   :  { %v1452_v6 = vsel %vm4303_vm7, %v4171_v54, %v1449_v56  ;;  %v1340_v4 = vor.u32 4788187, %v1339_v47  ;;  %v1629_v7 = vsel %vm1627_vm0, %v1628_v21, %v4375_v25  ;;  %v1343_v14 = vcvt.s32.f32 %v1336_v40 }
 0x8a1   :  { %3696 = vcosq.f32 %v1452_v6  ;;  %v1630_v16 = vadd.s32 %v1629_v7, %v1625_v1  ;;  %v1482_v17 = vsub.s32 32, %v1481_v22  ;;  %v1480_v11 = vshrl.u32 %v1479_v53, 5 }
 0x8a2   :  { %3698 = vsinq.f32 %v1452_v6  ;;  %v1341_v61 = vand.u32 2147483647, %v1340_v4  ;;  %v1484_v20 = vshll.u32 %v3742_v34, %v1481_v22  ;;  %v1487_v27 = vshll.u32 %v3743_v36, %v1481_v22 }
 0x8a3   :  { %v1490_v2 = vshll.u32 %v3744_v41, %v1481_v22  ;;  %v1631_v3 = vadd.s32 536870912, %v1630_v16  ;;  %v1485_v35 = vshrl.u32 %v3743_v36, %v1482_v17  ;;  %v1493_v29 = vshll.u32 %v3745_v18, %v1481_v22 }
 0x8a4   :  { %v1344_v30 = vmul.f32 %v1343_v14, %v1341_v61  ;;  %v1488_v39 = vshrl.u32 %v3744_v41, %v1482_v17  ;;  %v1491_v37 = vshrl.u32 %v3745_v18, %v1482_v17  ;;  %v1494_v43 = vshrl.u32 %v3746_v24, %v1482_v17 }
 0x8a5   :  { %v1497_v55 = vshrl.u32 %v3747_v48, %v1482_v17  ;;  %v4407_v42 = vshrl.u32 %v1631_v3, 30  ;;  %v1486_v19 = vor.u32 %v1485_v35, %v1484_v20  ;;  %v1496_v25 = vshll.u32 %v3746_v24, %v1481_v22 }
 0x8a6   :  { %v1345_v13 = vxor.u32 2147483648, %v1344_v30  ;;  %v1489_v46 = vor.u32 %v1488_v39, %v1487_v27  ;;  %v1492_v28 = vor.u32 %v1491_v37, %v1490_v2  ;;  %v1495_v32 = vor.u32 %v1494_v43, %v1493_v29 }
 0x8a7   :  { %v1875_v36 = vand.u32 3, %v1874_v38  ;;  %v1633_v41 = vshll.u32 %v4407_v42, 30  ;;  %v1498_v18 = vor.u32 %v1497_v55, %v1496_v25  ;;  %vm1499_vm2 = vcmp.lt.s32.totalorder %v1480_v11, 1  ;;  %v2101_v25 = vld [vmem:[%s5032_s7 + $0x20] sm:$0x1] }
 0x8a8   :  { %v1346_v26 = vsel %vm1263_vm6, %v1345_v13, %v1344_v30  ;;  %v1483_v51 = vshrl.u32 %v3742_v34, %v1482_v17  ;;  %vm1500_vm3 = vcmp.lt.s32.totalorder %v1480_v11, 2  ;;  %vm1502_vm4 = vcmp.lt.s32.totalorder %v1480_v11, 4 }
 0x8a9   :  { %v1349_v48 = vsel %vm4329_vm8, %v4184_v60, %v1346_v26  ;;  %v4419_v53 = vsub.s32 %v1630_v16, %v1633_v41  ;;  %v1504_v56 = vsel %vm1502_vm4, %v1492_v28, 2102212464  ;;  %v1507_v40 = vsel %vm1499_vm2, %v1486_v19, %v1489_v46 }
 0x8aa   :  { %3700 = vcosq.f32 %v1349_v48  ;;  %vm1456_vm6 = vweird.f32 %v4171_v54  ;;  %vm1501_vm7 = vcmp.lt.s32.totalorder %v1480_v11, 3  ;;  %v1503_v8 = vsel %vm1499_vm2, %v1483_v51, %v1486_v19  ;;  %v2097_v19 = vld [vmem:[%s5032_s7] sm:$0xff] }
 0x8ab   :  { %v4417_v24 = vpop.eup %3696  ;;  %3702 = vsinq.f32 %v1349_v48  ;;  %v1508_v38 = vsel %vm1502_vm4, %v1495_v32, 920167782  ;;  %v1636_v34 = vsub.s32 0, %v4419_v53  ;;  %v1511_v21 = vsel %vm1499_vm2, %v1489_v46, %v1492_v28 }
 0x8ac   :  { %v4423_v47 = vpop.eup %3698  ;;  %v1509_v6 = vsel %vm1501_vm7, %v1492_v28, %v1508_v38  ;;  %v1512_v4 = vsel %vm1502_vm4, %v1498_v18, 1326507024  ;;  %v1505_v1 = vsel %vm1501_vm7, %v1489_v46, %v1504_v56  ;;  %v1771_v27 = vand.u32 3, %v1770_v57 }
 0x8ad   :  { %v1510_v22 = vsel %vm1500_vm3, %v1507_v40, %v1509_v6  ;;  %v1513_v7 = vsel %vm1501_vm7, %v1495_v32, %v1512_v4  ;;  %v1460_v61 = vxor.u32 2147483648, %v4423_v47  ;;  %v3058_v14 = vmin.u32 %v1636_v34, %v4419_v53  ;;  %v2099_v34 = vld [vmem:[%s5032_s7 + $0x10] sm:$0xff] }
 0x8ae   :  { %v1514_v16 = vsel %vm1500_vm3, %v1511_v21, %v1513_v7  ;;  %v4433_v17 = vmul.u32.u64.low %v4396_v9, %v1510_v22  ;;  %v4434_v20 = vmul.u32.u64.high %v4396_v9, %v1510_v22, %v4433_v17  ;;  %v1463_v3 = vxor.u32 2147483648, %v4417_v24  ;;  %v2103_v6 = vld [vmem:[%s5032_s7 + $0x30] sm:$0x1] }
 0x8af   :  { %v4438_v2 = vmul.u32.u64.low %v4396_v9, %v1514_v16  ;;  %v4439_v30 = vmul.u32.u64.high %v4396_v9, %v1514_v16, %v4438_v2  ;;  %v1638_v35 = vclz %v3058_v14  ;;  %v1506_v29 = vsel %vm1500_vm3, %v1503_v8, %v1505_v1 }
 0x8b0   :  { %vm1877_vm8 = vcmp.eq.s32.totalorder %v1875_v36, 0  ;;  %vm1880_vm9 = vcmp.eq.s32.totalorder %v1875_v36, 2  ;;  %vm1353_vm10 = vweird.f32 %v4184_v60  ;;  %vm1355_vm11 = vcmp.lt.s32.totalorder %v4389_v62, 2 }
 0x8b1   :  { %vm1876_vm12 = vcmp.lt.s32.totalorder %v1875_v36, 2  ;;  %v1879_v57 = vsel %vm1877_vm8, %v4417_v24, %v1460_v61  ;;  %v1882_v39 = vsel %vm1880_vm9, %v1463_v3, %v4423_v47  ;;  %vm1356_vm13 = vcmp.eq.s32.totalorder %v4389_v62, 0 }
 0x8b2   :  { %v3059_v37 = vadd.s32 4294967294, %v1638_v35  ;;  %v1525_v11 = vadd.s32 1, %v4434_v20  ;;  %vm2114_vm14 = vcmask 72704   ;;  %v1883_v43 = vsel %vm1876_vm12, %v1879_v57, %v1882_v39 }
 0x8b3   :  { %vm1359_vm15 = vcmp.eq.s32.totalorder %v4389_v62, 2  ;;  %v1522_v55 = vmul.u32 %v4396_v9, %v1506_v29  ;;  %vm1524_vm0 = vc.u32 %v4439_v30, %v4433_v17  ;;  %v1884_v13 = vsel %vm1456_vm6, nan, %v1883_v43 }
 0x8b4   :  { %v3701_v46 = vpop.eup %3700  ;;  %vm1772_vm2 = vcmp.lt.s32.totalorder %v1771_v27, 2  ;;  %vm3060_vm3 = vcmp.lt.s32.totalorder %v3059_v37, 0  ;;  %v1526_v28 = vsel %vm1524_vm0, %v1525_v11, %v4434_v20  ;;  %v2094_v9 = vmul.f32 %v1884_v13, %v1258_v59 }
 0x8b5   :  { %v3703_v32 = vpop.eup %3702  ;;  %v1360_v36 = vxor.u32 2147483648, %v3701_v46  ;;  %vm1773_vm4 = vcmp.eq.s32.totalorder %v1771_v27, 0  ;;  %v1641_v26 = vsel %vm3060_vm3, 0, %v3059_v37  ;;  %v1527_v41 = vadd.s32 %v1526_v28, %v1522_v55 }
 0x8b6   :  { %v1357_v18 = vxor.u32 2147483648, %v3703_v32  ;;  %vm1776_vm7 = vcmp.eq.s32.totalorder %v1771_v27, 2  ;;  %v1646_v48 = vsub.s32 4294967266, %v1641_v26  ;;  %v3522_v51 = vpack.c.bf16 %v2101_v25, %v2097_v19 }
 0x8b7   :  { %v1361_v56 = vsel %vm1359_vm15, %v1360_v36, %v3703_v32  ;;  %v1778_v40 = vsel %vm1776_vm7, %v1360_v36, %v3703_v32  ;;  %v1642_v8 = vsub.s32 32, %v1641_v26  ;;  %v1528_v38 = vadd.s32 536870912, %v1527_v41 }
 0x8b8   :  { %v1358_v21 = vsel %vm1356_vm13, %v3701_v46, %v1357_v18  ;;  %v1775_v4 = vsel %vm1773_vm4, %v3701_v46, %v1357_v18  ;;  %v1647_v1 = vadd.s32 127, %v1646_v48  ;;  %v1457_v22 = vand.u32 3, %v4319_v0 }
 0x8b9   :  { %v1362_v7 = vsel %vm1355_vm11, %v1358_v21, %v1361_v56  ;;  %v1779_v14 = vsel %vm1772_vm2, %v1775_v4, %v1778_v40  ;;  %v1626_v16 = vadd.s32 %v4374_v31, %v4371_v44  ;;  %v4484_v20 = vshrl.u32 %v1528_v38, 30 }
 0x8ba   :  { %v1363_v2 = vsel %vm1353_vm10, nan, %v1362_v7  ;;  %v1780_v35 = vsel %vm1353_vm10, nan, %v1779_v14  ;;  %v1648_v29 = vshll.u32 %v1647_v1, 23  ;;  %v3528_v57 = vpack.c.bf16 %v2103_v6, %v2099_v34 }
 0x8bb   :  { %v4492_v0 = vmul.f32 %v1363_v2, %v1257_v58  ;;  %v2093_v62 = vmul.f32 %v1780_v35, %v1257_v58  ;;  %v1644_v27 = vshrl.u32 %v1626_v16, %v1642_v8  ;;  %v1530_v44 = vshll.u32 %v4484_v20, 30 }
 0x8bc   :  { %v1643_v31 = vshll.u32 %v4419_v53, %v1641_v26  ;;  %vm1459_vm8 = vcmp.eq.s32.totalorder %v1457_v22, 0  ;;  %v1649_v39 = vor.u32 4788187, %v1648_v29  ;;  %vm1462_vm9 = vcmp.eq.s32.totalorder %v1457_v22, 2 }
 0x8bd   :  { %v1531_v37 = vsub.s32 %v1527_v41, %v1530_v44  ;;  %3087 = vmatmul.mubr.msk.f32.vlgmr.msra.gmra.mrb[16].mxu0 %vm2114_vm14, %v2093_v62  ;;  %3093 = vmatmul.mubr.msk.f32.vlgmr.msra.gmra.mrb[32].mxu1 %vm2114_vm14, %v2093_v62  ;;  %v1461_v60 = vsel %vm1459_vm8, %v4417_v24, %v1460_v61  ;;  %vm1458_vm10 = vcmp.lt.s32.totalorder %v1457_v22, 2  ;;  %v1464_v50 = vsel %vm1462_vm9, %v1463_v3, %v4423_v47 }
 0x8be   :  { %2210 = vmatprep.mubr.f32.mxu0 %v3741_v52  ;;  %2299 = vmatprep.mubr.f32.mxu1 %v3741_v52  ;;  %v1645_v58 = vor.u32 %v1644_v27, %v1643_v31  ;;  %v1465_v11 = vsel %vm1458_vm10, %v1461_v60, %v1464_v50  ;;  %v1650_v43 = vand.u32 2147483647, %v1649_v39  ;;  %v1523_v25 = vadd.s32 %v4433_v17, %v4439_v30 }
 0x8bf   :  { %v1533_v53 = vsub.s32 0, %v1531_v37  ;;  %3524 = vmatpush1.bf16.msk.msra.mxu0 %vm4149_vm5, %v3522_v51  ;;  %3530 = vmatpush1.bf16.msk.msra.mxu1 %vm4149_vm5, %v3528_v57  ;;  %v1466_v61 = vsel %vm1456_vm6, nan, %v1465_v11  ;;  %vm1572_vm6 = vcmp.lt.s32.totalorder %v4215_v15, 0  ;;  %vm4529_vm11 = vcmp.le.f32.partialorder %v1570_v33, 0.7853982 }
 0x8c0   :  { %v4518_v24 = vmul.f32 %v1466_v61, %v1258_v59  ;;  %v1652_v45 = vcvt.s32.f32 %v1645_v58  ;;  %v1656_v51 = vsub.s32 4, %v4407_v42  ;;  %v1147_v56 = vadd.f32 %v4191_v63, %v4210_v12 }
 0x8c1   :  { %v3054_v55 = vmin.u32 %v1533_v53, %v1531_v37  ;;  %3088 = vmatmul.mubr.msk.f32.gmra.mrb[18].mxu0 %vm2114_vm14, %v2094_v9  ;;  %3094 = vmatmul.mubr.msk.f32.gmra.mrb[34].mxu1 %vm2114_vm14, %v2094_v9  ;;  %v1553_v8 = vsub.s32 4, %v4484_v20  ;;  %v1152_v38 = vadd.f32 %v4203_v5, %v4191_v63  ;;  %vm1469_vm12 = vcmp.lt.s32.totalorder %v4274_v23, 0 }
 0x8c2   :  { %2216 = vmatprep.mubr.f32.mxu0 %v3741_v52  ;;  %2305 = vmatprep.mubr.f32.mxu1 %v3741_v52  ;;  %v1653_v3 = vmul.f32 %v1652_v45, %v1650_v43  ;;  %v1657_v34 = vsel %vm1572_vm6, %v1656_v51, %v4407_v42  ;;  %v1253_v6 = vmul.f32 1.442695, %v1147_v56  ;;  %vm1468_vm13 = vcmp.le.f32.partialorder %v1467_v49, 0.7853982 }
 0x8c3   :  { %v1535_v47 = vclz %v3054_v55  ;;  %v1554_v12 = vsel %vm1469_vm12, %v1553_v8, %v4484_v20  ;;  %v1659_v1 = vsel %vm4529_vm11, 0, %v1657_v34  ;;  %v1255_v5 = vmul.f32 1.442695, %v1152_v38 }
 0x8c4   :  { %v1654_v19 = vxor.u32 2147483648, %v1653_v3  ;;  %v1556_v63 = vsel %vm1468_vm13, 0, %v1554_v12  ;;  %v2082_v42 = vadd.s32 3, %v1659_v1  ;;  %vm1559_vm8 = vweird.f32 %v4274_v23 }
 0x8c5   :  { %v3055_v13 = vadd.s32 4294967294, %v1535_v47  ;;  %v1978_v7 = vadd.s32 3, %v1556_v63  ;;  %vm1662_vm9 = vweird.f32 %v4215_v15  ;;  %v1560_v45 = vand.u32 3, %v1556_v63 }
 0x8c6   :  { %v1655_v32 = vsel %vm1572_vm6, %v1654_v19, %v1653_v3  ;;  %v2083_v16 = vand.u32 3, %v2082_v42  ;;  %v1663_v3 = vand.u32 3, %v1659_v1  ;;  %v5050_v34 = vmov 0  ;;  %v2778_v42 = vld [vmem:[%s5033_s8 + $0xa0] sm:$0xff] }
 0x8c7   :  { %vm3056_vm5 = vcmp.lt.s32.totalorder %v3055_v13, 0  ;;  %v1658_v17 = vsel %vm4529_vm11, %v4215_v15, %v1655_v32  ;;  %v1979_v49 = vand.u32 3, %v1978_v7  ;;  %vm1562_vm10 = vcmp.eq.s32.totalorder %v1560_v45, 0  ;;  %v2810_v7 = vld [vmem:[%s5033_s8 + $0x1a0] sm:$0xff] }
 0x8c8   :  { %v1538_v54 = vsel %vm3056_vm5, 0, %v3055_v13  ;;  %3704 = vcosq.f32 %v1658_v17  ;;  %vm2085_vm15 = vcmp.eq.s32.totalorder %v2083_v16, 0  ;;  %vm2088_vm0 = vcmp.eq.s32.totalorder %v2083_v16, 2 }
 0x8c9   :  { %v1539_v46 = vsub.s32 32, %v1538_v54  ;;  %v1543_v28 = vsub.s32 4294967266, %v1538_v54  ;;  %v1540_v9 = vshll.u32 %v1531_v37, %v1538_v54  ;;  %3706 = vsinq.f32 %v1658_v17 }
 0x8ca   :  { %vm1984_vm2 = vcmp.eq.s32.totalorder %v1979_v49, 2  ;;  %vm1981_vm3 = vcmp.eq.s32.totalorder %v1979_v49, 0  ;;  %vm1980_vm4 = vcmp.lt.s32.totalorder %v1979_v49, 2  ;;  %vm2084_vm7 = vcmp.lt.s32.totalorder %v2083_v16, 2 }
 0x8cb   :  { %v1541_v10 = vshrl.u32 %v1523_v25, %v1539_v46  ;;  %v1544_v59 = vadd.s32 127, %v1543_v28  ;;  %vm1565_vm5 = vcmp.eq.s32.totalorder %v1560_v45, 2  ;;  %vm1561_vm6 = vcmp.lt.s32.totalorder %v1560_v45, 2 }
 0x8cc   :  { %vm1665_vm11 = vcmp.eq.s32.totalorder %v1663_v3, 0 }
 0x8cd   :  { %v1542_v36 = vor.u32 %v1541_v10, %v1540_v9  ;;  %v1545_v26 = vshll.u32 %v1544_v59, 23 }
 0x8cf   :  { %v1546_v18 = vor.u32 4788187, %v1545_v26  ;;  %v1549_v48 = vcvt.s32.f32 %v1542_v36 }
 0x8d1   :  { %v1547_v30 = vand.u32 2147483647, %v1546_v18 }
 0x8d2   :  { %v3705_v22 = vpop.eup %3704 }
 0x8d3   :  { %v1550_v40 = vmul.f32 %v1549_v48, %v1547_v30  ;;  %v3707_v14 = vpop.eup %3706  ;;  %v1669_v35 = vxor.u32 2147483648, %v3705_v22 }
 0x8d4   :  { %v1666_v2 = vxor.u32 2147483648, %v3707_v14 }
 0x8d5   :  { %v1551_v33 = vxor.u32 2147483648, %v1550_v40  ;;  %v2090_v31 = vsel %vm2088_vm0, %v1669_v35, %v3707_v14 }
 0x8d6   :  { %v2087_v44 = vsel %vm2085_vm15, %v3705_v22, %v1666_v2  ;;  %v1667_v25 = vsel %vm1665_vm11, %v3705_v22, %v1666_v2  ;;  %v2779_v22 = vld [vmem:[%s5033_s8 + $0xa8] sm:$0xff] }
 0x8d7   :  { %v1552_v21 = vsel %vm1469_vm12, %v1551_v33, %v1550_v40  ;;  %v2091_v58 = vsel %vm2084_vm7, %v2087_v44, %v2090_v31  ;;  %vm1668_vm12 = vcmp.eq.s32.totalorder %v1663_v3, 2 }
 0x8d8   :  { %v1555_v4 = vsel %vm1468_vm13, %v4274_v23, %v1552_v21  ;;  %v2092_v43 = vsel %vm1662_vm9, nan, %v2091_v58  ;;  %v1670_v46 = vsel %vm1668_vm12, %v1669_v35, %v3707_v14  ;;  %vm1664_vm13 = vcmp.lt.s32.totalorder %v1663_v3, 2 }
 0x8d9   :  { %3708 = vcosq.f32 %v1555_v4 }
 0x8da   :  { %3710 = vsinq.f32 %v1555_v4  ;;  %v5054_v4 = vmov 0 }
 0x8db   :  { %3712 = vpow2.f32 %v1253_v6 }
 0x8dc   :  { %3714 = vpow2.f32 %v1255_v5 }
 0x8e3   :  { %v3709_v20 = vpop.eup %3708 }
 0x8e4   :  { %v3711_v29 = vpop.eup %3710  ;;  %v1566_v57 = vxor.u32 2147483648, %v3709_v20 }
 0x8e5   :  { %v3713_v62 = vpop.eup %3712  ;;  %v1563_v27 = vxor.u32 2147483648, %v3711_v29 }
 0x8e6   :  { %v1986_v39 = vsel %vm1984_vm2, %v1566_v57, %v3711_v29  ;;  %v1259_v60 = vmin.f32 %v3713_v62, 100.0  ;;  %v3715_v53 = vpop.eup %3714  ;;  %v1567_v54 = vsel %vm1565_vm5, %v1566_v57, %v3711_v29  ;;  %v5068_v29 = vmov 0 }
 0x8e7   :  { %v1983_v37 = vsel %vm1981_vm3, %v3709_v20, %v1563_v27  ;;  %v1260_v55 = vmin.f32 %v3715_v53, 100.0  ;;  %v1564_v13 = vsel %vm1562_vm10, %v3709_v20, %v1563_v27  ;;  %v5066_v20 = vmov 0 }
 0x8e8   :  { %v1987_v50 = vsel %vm1980_vm4, %v1983_v37, %v1986_v39  ;;  %v1568_v19 = vsel %vm1561_vm6, %v1564_v13, %v1567_v54  ;;  %v5073_v53 = vmov 0 }
 0x8e9   :  { %v1988_v11 = vsel %vm1559_vm8, nan, %v1987_v50  ;;  %v2096_v47 = vmul.f32 %v2092_v43, %v1260_v55  ;;  %v1569_v28 = vsel %vm1559_vm8, nan, %v1568_v19  ;;  %v2766_v19 = vld [vmem:[%s5033_s8 + $0x40] sm:$0xff] }
 0x8ea   :  { %v2095_v61 = vmul.f32 %v1988_v11, %v1259_v60  ;;  %v1675_v9 = vmul.f32 %v1569_v28, %v1259_v60  ;;  %v5076_v11 = vmov 0 }
 0x8ec   :  { %3089 = vmatmul.mubr.msk.f32.gmra.mrb[20].mxu0 %vm2114_vm14, %v2095_v61  ;;  %3095 = vmatmul.mubr.msk.f32.gmra.mrb[36].mxu1 %vm2114_vm14, %v2095_v61 }
 0x8ed   :  { %2222 = vmatprep.mubr.f32.mxu0 %v3741_v52  ;;  %2311 = vmatprep.mubr.f32.mxu1 %v3741_v52 }
 0x8f0   :  { %3090 = vmatmul.mubr.msk.f32.gmra.mrb[22].mxu0 %vm2114_vm14, %v2096_v47  ;;  %3096 = vmatmul.mubr.msk.f32.gmra.mrb[38].mxu1 %vm2114_vm14, %v2096_v47  ;;  %v2814_v47 = vld [vmem:[%s5033_s8 + $0x1c0] sm:$0xff] }
 0x8f1   :  { %2406 = vmatprep.mubr.f32.mxu0 %v3741_v52  ;;  %2495 = vmatprep.mubr.f32.mxu1 %v3741_v52 }
 0x8f4   :  { %3099 = vmatmul.mubr.msk.f32.vlgmr.msra.gmra.mrb[16].mxu0 %vm2114_vm14, %v4492_v0  ;;  %3105 = vmatmul.mubr.msk.f32.vlgmr.msra.gmra.mrb[32].mxu1 %vm2114_vm14, %v4492_v0  ;;  %v1671_v0 = vsel %vm1664_vm13, %v1667_v25, %v1670_v46  ;;  %v2774_v25 = vld [vmem:[%s5033_s8 + $0x80] sm:$0xff]  ;;  %v2775_v46 = vld [vmem:[%s5033_s8 + $0x88] sm:$0xff] }
 0x8f5   :  { %2412 = vmatprep.mubr.f32.mxu0 %v3741_v52  ;;  %2501 = vmatprep.mubr.f32.mxu1 %v3741_v52  ;;  %v1672_v10 = vsel %vm1662_vm9, nan, %v1671_v0  ;;  %v2798_v0 = vld [vmem:[%s5033_s8 + $0x140] sm:$0xff] }
 0x8f6   :  { %v1676_v23 = vmul.f32 %v1672_v10, %v1260_v55  ;;  %v2807_v10 = vld [vmem:[%s5033_s8 + $0x188] sm:$0xff] }
 0x8f8   :  { %3100 = vmatmul.mubr.msk.f32.gmra.mrb[18].mxu0 %vm2114_vm14, %v4518_v24  ;;  %3106 = vmatmul.mubr.msk.f32.gmra.mrb[34].mxu1 %vm2114_vm14, %v4518_v24  ;;  %v2520_v24 = vlaneseq }
 0x8f9   :  { %2418 = vmatprep.mubr.f32.mxu0 %v3741_v52  ;;  %2507 = vmatprep.mubr.f32.mxu1 %v3741_v52 }
 0x8fa   :  { %v4590_v15 = vshrl.u32 %v2520_v24, 7  ;;  %v4594_v26 = vand.u32 127, %v2520_v24 }
 0x8fc   :  { %3101 = vmatmul.mubr.msk.f32.gmra.mrb[20].mxu0 %vm2114_vm14, %v1675_v9  ;;  %3107 = vmatmul.mubr.msk.f32.gmra.mrb[36].mxu1 %vm2114_vm14, %v1675_v9  ;;  %v2522_v59 = vadd.s32 8, %v4590_v15  ;;  %v2530_v32 = vand.u32 15, %v4590_v15  ;;  %v2523_v17 = vadd.s32 16, %v4590_v15  ;;  %v2524_v30 = vadd.s32 24, %v4590_v15  ;;  %v2806_v9 = vld [vmem:[%s5033_s8 + $0x180] sm:$0xff] }
 0x8fd   :  { %2424 = vmatprep.mubr.f32.mxu0 %v3741_v52  ;;  %2513 = vmatprep.mubr.f32.mxu1 %v3741_v52  ;;  %v2527_v48 = vadd.s32 128, %v4594_v26  ;;  %v4600_v56 = vadd.s32 384, %v4594_v26  ;;  %v4619_v12 = vadd.s32 256, %v4594_v26  ;;  %v2608_v57 = vadd.s32 1, %v4590_v15 }
 0x8fe   :  { %v2531_v36 = vand.u32 15, %v2522_v59  ;;  %v2534_v41 = vmul.u32 32, %v2530_v32  ;;  %v2532_v8 = vand.u32 15, %v2523_v17  ;;  %v2533_v33 = vand.u32 15, %v2524_v30 }
 0x8ff   :  { %v2606_v61 = vmul.u32 16, %v4590_v15  ;;  %v2609_v43 = vmul.u32 16, %v2608_v57  ;;  %v2758_v15 = vld [vmem:[%s5033_s8] sm:$0xff] }
 0x900   :  { %3102 = vmatmul.mubr.msk.f32.gmra.mrb[22].mxu0 %vm2114_vm14, %v1676_v23  ;;  %3108 = vmatmul.mubr.msk.f32.gmra.mrb[38].mxu1 %vm2114_vm14, %v1676_v23  ;;  %v2535_v18 = vmul.u32 32, %v2531_v36  ;;  %v2554_v51 = vadd.s32 32, %v2534_v41  ;;  %vm2539_vm14 = vcmp.ge.s32.totalorder %v2527_v48, %v2534_v41  ;;  %vm2541_vm0 = vcmp.ge.s32.totalorder %v4600_v56, %v2534_v41  ;;  %v2794_v57 = vld [vmem:[%s5033_s8 + $0x120] sm:$0xff] }
 0x901   :  { %2680 = vmatprep.mubr.f32.mxu0 %v3741_v52  ;;  %2751 = vmatprep.mubr.f32.mxu1 %v3741_v52  ;;  %v4604_v38 = vmul.u32 32, %v2532_v8  ;;  %v4612_v6 = vmul.u32 32, %v2533_v33  ;;  %vm2538_vm11 = vcmp.ge.s32.totalorder %v4594_v26, %v2534_v41  ;;  %v2777_v8 = vld [vmem:[%s5033_s8 + $0x98] sm:$0xff]  ;;  %v2808_v33 = vld [vmem:[%s5033_s8 + $0x190] sm:$0xff] }
 0x902   :  { %v2555_v40 = vadd.s32 32, %v2535_v18  ;;  %vm2559_vm15 = vcmp.lt.s32.totalorder %v2527_v48, %v2554_v51  ;;  %vm2561_vm2 = vcmp.lt.s32.totalorder %v4600_v56, %v2554_v51  ;;  %vm2543_vm3 = vcmp.ge.s32.totalorder %v2527_v48, %v2535_v18 }
 0x903   :  { %vm4606_vm7 = vmand %vm2539_vm14, %vm2559_vm15  ;;  %vm2545_vm8 = vcmp.ge.s32.totalorder %v4600_v56, %v2535_v18  ;;  %vm2558_vm12 = vcmp.lt.s32.totalorder %v4594_v26, %v2554_v51  ;;  %v2556_v63 = vadd.s32 32, %v4604_v38  ;;  %vm2542_vm13 = vcmp.ge.s32.totalorder %v4594_v26, %v2535_v18 }
 0x904   :  { %vm2563_vm4 = vcmp.lt.s32.totalorder %v2527_v48, %v2555_v40  ;;  %v5051_v34 = vsel %vm4606_vm7, 4294967295, %v5050_v34  ;;  %vm2565_vm9 = vcmp.lt.s32.totalorder %v4600_v56, %v2555_v40  ;;  %vm4614_vm10 = vmand %vm2541_vm0, %vm2561_vm2  ;;  %vm2562_vm14 = vcmp.lt.s32.totalorder %v4594_v26, %v2555_v40 }
 0x905   :  { %vm4621_vm5 = vmand %vm2543_vm3, %vm2563_vm4  ;;  %v2557_v5 = vadd.s32 32, %v4612_v6  ;;  %vm2540_vm15 = vcmp.ge.s32.totalorder %v4619_v12, %v2534_v41  ;;  %vm2560_vm0 = vcmp.lt.s32.totalorder %v4619_v12, %v2554_v51  ;;  %vm2547_vm2 = vcmp.ge.s32.totalorder %v2527_v48, %v4604_v38  ;;  %v2759_v41 = vld [vmem:[%s5033_s8 + $0x8] sm:$0xff] }
 0x906   :  { %v5055_v4 = vsel %vm4621_vm5, 4294967295, %v5054_v4  ;;  %vm4625_vm6 = vmand %vm2545_vm8, %vm2565_vm9  ;;  %vm2544_vm8 = vcmp.ge.s32.totalorder %v4619_v12, %v2535_v18  ;;  %vm2564_vm9 = vcmp.lt.s32.totalorder %v4619_v12, %v2555_v40  ;;  %vm2567_vm7 = vcmp.lt.s32.totalorder %v2527_v48, %v2556_v63  ;;  %v2790_v18 = vld [vmem:[%s5033_s8 + $0x100] sm:$0xff]  ;;  %v2776_v40 = vld [vmem:[%s5033_s8 + $0x90] sm:$0xff] }
 0x907   :  { %vm4645_vm4 = vmand %vm2538_vm11, %vm2558_vm12  ;;  %vm2551_vm11 = vcmp.ge.s32.totalorder %v2527_v48, %v4612_v6  ;;  %vm2571_vm12 = vcmp.lt.s32.totalorder %v2527_v48, %v2557_v5  ;;  %v3555_v48 = vpack.c.bf16 %v2775_v46, %v2774_v25  ;;  %v3587_v51 = vpack.c.bf16 %v2807_v10, %v2806_v9  ;;  %v2767_v25 = vld [vmem:[%s5033_s8 + $0x48] sm:$0xff]  ;;  %v2784_v10 = vld [vmem:[%s5033_s8 + $0xd0] sm:$0xff] }
 0x908   :  { %vm4651_vm1 = vmand %vm2542_vm13, %vm2562_vm14  ;;  %v3559_v1 = vpack.c.bf16 %v2777_v8, %v2776_v40  ;;  %v2799_v9 = vld [vmem:[%s5033_s8 + $0x148] sm:$0xff] }
 0x909   :  { %vm4656_vm5 = vmand %vm2540_vm15, %vm2560_vm0  ;;  %vm2549_vm15 = vcmp.ge.s32.totalorder %v4600_v56, %v4604_v38  ;;  %vm2569_vm0 = vcmp.lt.s32.totalorder %v4600_v56, %v2556_v63  ;;  %v2819_v40 = vld [vmem:[%s5033_s8 + $0x1e8] sm:$0xff] }
 0x90a   :  { %vm4661_vm3 = vmand %vm2544_vm8, %vm2564_vm9  ;;  %vm5072_vm8 = vcmp.ge.s32.totalorder %v4600_v56, %v4612_v6 }
 0x90b   :  { %vm4665_vm13 = vmand %vm2547_vm2, %vm2567_vm7  ;;  %vm2573_vm2 = vcmp.lt.s32.totalorder %v4600_v56, %v2557_v5  ;;  %v2791_v56 = vld [vmem:[%s5033_s8 + $0x108] sm:$0xff] }
 0x90c   :  { %v5067_v20 = vsel %vm4665_vm13, 4294967295, %v5066_v20  ;;  %vm4669_vm14 = vmand %vm2551_vm11, %vm2571_vm12  ;;  %vm2566_vm12 = vcmp.lt.s32.totalorder %v4594_v26, %v2556_v63  ;;  %vm5075_vm11 = vcmp.ge.s32.totalorder %v4594_v26, %v4604_v38  ;;  %v3589_v21 = vpack.c.bf16 %v2791_v56, %v2790_v18  ;;  %v2818_v56 = vld [vmem:[%s5033_s8 + $0x1e0] sm:$0xff] }
 0x90d   :  { %v5069_v29 = vsel %vm4669_vm14, 4294967295, %v5068_v29  ;;  %vm4700_vm9 = vmand %vm2549_vm15, %vm2569_vm0  ;;  %vm2552_vm14 = vcmp.ge.s32.totalorder %v4619_v12, %v4612_v6  ;;  %vm5079_vm15 = vnez %v5051_v34 }
 0x90e   :  { %vm4712_vm13 = vmand %vm5072_vm8, %vm2573_vm2  ;;  %vm2572_vm8 = vcmp.lt.s32.totalorder %v4619_v12, %v2557_v5  ;;  %vm5078_vm2 = vnez %v5055_v4  ;;  %v2761_v4 = vld [vmem:[%s5033_s8 + $0x18] sm:$0xff] }
 0x90f   :  { %v5074_v53 = vsel %vm4712_vm13, 4294967295, %v5073_v53  ;;  %vm4722_vm7 = vmand %vm5075_vm11, %vm2566_vm12  ;;  %vm5082_vm12 = vcmp.lt.s32.totalorder %v4594_v26, %v2557_v5  ;;  %v2792_v5 = vld [vmem:[%s5033_s8 + $0x110] sm:$0xff] }
 0x910   :  { %v5077_v11 = vsel %vm4722_vm7, 4294967295, %v5076_v11  ;;  %vm5080_vm0 = vmpackc.low %vm5078_vm2, %vm5079_vm15  ;;  %vm5083_vm7 = vcmp.ge.s32.totalorder %v4594_v26, %v4612_v6  ;;  %v3557_v6 = vpack.c.bf16 %v2759_v41, %v2758_v15  ;;  %v2817_v15 = vld [vmem:[%s5033_s8 + $0x1d8] sm:$0xff] }
 0x911   :  { %vm5081_vm11 = vmpackc.low %vm4625_vm6, %vm4614_vm10  ;;  %vm5088_vm6 = vcmp.lt.s32.totalorder %v4619_v12, %v2556_v63 }
 0x912   :  { %vm4745_vm13 = vmand %vm5083_vm7, %vm5082_vm12  ;;  %vm5089_vm7 = vcmp.ge.s32.totalorder %v4619_v12, %v4604_v38  ;;  %v2809_v38 = vld [vmem:[%s5033_s8 + $0x198] sm:$0xff]  ;;  %v2760_v12 = vld [vmem:[%s5033_s8 + $0x10] sm:$0xff] }
 0x913   :  { %vm5086_vm15 = vmpackc.low %vm4651_vm1, %vm4645_vm4  ;;  %vm5094_vm1 = vnez %v5074_v53  ;;  %vm4788_vm4 = vcmp.lt.s32.totalorder %v4594_v26, %v2609_v43  ;;  %v3591_v63 = vpack.c.bf16 %v2809_v38, %v2808_v33  ;;  %v2797_v43 = vld [vmem:[%s5033_s8 + $0x138] sm:$0xff]  ;;  %v2770_v38 = vld [vmem:[%s5033_s8 + $0x60] sm:$0xff] }
 0x914   :  { %vm5087_vm10 = vmpackc.low %vm4661_vm3, %vm4656_vm5  ;;  %vm4783_vm3 = vcmp.ge.s32.totalorder %v4594_v26, %v2606_v61  ;;  %v2796_v61 = vld [vmem:[%s5033_s8 + $0x130] sm:$0xff] }
 0x915   :  { %vm4768_vm2 = vmand %vm2552_vm14, %vm2572_vm8  ;;  %vm5099_vm14 = vnez %v5077_v11  ;;  %v3601_v54 = vpack.c.bf16 %v2797_v43, %v2796_v61 }
 0x916   :  { %vm3550_vm5 = vmpackc.low %vm5094_vm1, %vm4700_vm9 }
 0x917   :  { %vm3541_vm8 = vmpackc.low %vm4745_vm13, %vm5099_vm14  ;;  %vm5103_vm13 = vcmask 261120  }
 0x918   :  { %vm2611_vm12 = vmand %vm4783_vm3, %vm4788_vm4 }
 0x919   :  { %v2612_v34 = vsel %vm2611_vm12, 1.0, %v3741_v52  ;;  %v2793_v52 = vld [vmem:[%s5033_s8 + $0x118] sm:$0xff]  ;;  %vm5104_vm9 = vmmov %vm5103_vm13 }
 0x91a   :  { %v3593_v49 = vpack.c.bf16 %v2793_v52, %v2792_v5  ;;  %v2820_v5 = vld [vmem:[%s5033_s8 + $0x1f0] sm:$0xff]  ;;  %v2821_v52 = vld [vmem:[%s5033_s8 + $0x1f8] sm:$0xff] }
 0x9c7   :  { %v2408_v14 = vpop.f32.mrb[16].mxu0  ;;  %v2497_v16 = vpop.f32.mrb[32].mxu1 }
 0x9c8   :  { %v2410_v2 = vpop.f32.mrb[17].mxu0  ;;  %v2499_v35 = vpop.f32.mrb[33].mxu1 }
 0x9cb   :  { %v2414_v62 = vpop.f32.mrb[18].mxu0  ;;  %v2503_v27 = vpop.f32.mrb[34].mxu1 }
 0x9cc   :  { %v3534_v44 = vpack.c.bf16 %v2414_v62, %v2408_v14  ;;  %v3546_v31 = vpack.c.bf16 %v2503_v27, %v2497_v16  ;;  %v2416_v39 = vpop.f32.mrb[19].mxu0  ;;  %v2505_v37 = vpop.f32.mrb[35].mxu1  ;;  %v2811_v14 = vld [vmem:[%s5033_s8 + $0x1a8] sm:$0xff]  ;;  %v3561_v16 = vpack.c.bf16 %v2761_v4, %v2760_v12  ;;  %v2780_v27 = vld [vmem:[%s5033_s8 + $0xb0] sm:$0xff]  ;;  %v2802_v12 = vld [vmem:[%s5033_s8 + $0x160] sm:$0xff] }
 0x9cd   :  { %v3531_v50 = vpack.c.bf16 %v2416_v39, %v2410_v2  ;;  %v3543_v58 = vpack.c.bf16 %v2505_v37, %v2499_v35  ;;  %v2762_v2 = vld [vmem:[%s5033_s8 + $0x20] sm:$0xff]  ;;  %v2763_v35 = vld [vmem:[%s5033_s8 + $0x28] sm:$0xff]  ;;  %v2813_v39 = vld [vmem:[%s5033_s8 + $0x1b8] sm:$0xff] }
 0x9ce   :  { %v2795_v62 = vld [vmem:[%s5033_s8 + $0x128] sm:$0xff]  ;;  %v3565_v37 = vpack.c.bf16 %v2763_v35, %v2762_v2  ;;  %v2804_v2 = vld [vmem:[%s5033_s8 + $0x170] sm:$0xff] }
 0x9cf   :  { %v2420_v55 = vpop.f32.mrb[20].mxu0  ;;  %v2509_v45 = vpop.f32.mrb[36].mxu1  ;;  %3533 = vmatprep.subr.msk.bf16.mxu0 %vm5080_vm0, %v3531_v50  ;;  %3545 = vmatprep.subr.msk.bf16.mxu1 %vm5081_vm11, %v3543_v58  ;;  %vm4764_vm0 = vmand %vm5089_vm7, %vm5088_vm6  ;;  %v3597_v60 = vpack.c.bf16 %v2795_v62, %v2794_v57  ;;  %v2764_v50 = vld [vmem:[%s5033_s8 + $0x30] sm:$0xff]  ;;  %v2765_v58 = vld [vmem:[%s5033_s8 + $0x38] sm:$0xff] }
 0x9d0   :  { %v2422_v3 = vpop.f32.mrb[21].mxu0  ;;  %v2511_v13 = vpop.f32.mrb[37].mxu1  ;;  %3536 = vmatpush1.bf16.msk.msra.mxu0 %vm5086_vm15, %v3534_v44  ;;  %3548 = vmatpush1.bf16.msk.msra.mxu1 %vm5087_vm10, %v3546_v31  ;;  %vm3553_vm11 = vmpackc.low %vm4768_vm2, %vm4764_vm0  ;;  %vm5100_vm15 = vnez %v5069_v29  ;;  %vm5101_vm10 = vnez %v5067_v20  ;;  %v3563_v20 = vpack.c.bf16 %v2779_v22, %v2778_v42  ;;  %v3595_v29 = vpack.c.bf16 %v2811_v14, %v2810_v7  ;;  %v2781_v44 = vld [vmem:[%s5033_s8 + $0xb8] sm:$0xff]  ;;  %v2812_v31 = vld [vmem:[%s5033_s8 + $0x1b0] sm:$0xff] }
 0x9d1   :  { %vm5102_vm6 = vmpackc.low %vm5100_vm15, %vm5101_vm10  ;;  %v3567_v53 = vpack.c.bf16 %v2781_v44, %v2780_v27  ;;  %v3599_v11 = vpack.c.bf16 %v2813_v39, %v2812_v31  ;;  %v2803_v4 = vld [vmem:[%s5033_s8 + $0x168] sm:$0xff]  ;;  %v3615_v14 = vpack.c.bf16 %v2821_v52, %v2820_v5 }
 0x9d2   :  { %v3613_v22 = vpack.c.bf16 %v2803_v4, %v2802_v12 }
 0x9d3   :  { %v2426_v23 = vpop.f32.mrb[22].mxu0  ;;  %v2515_v24 = vpop.f32.mrb[38].mxu1 }
 0x9d4   :  { %v3540_v59 = vpack.c.bf16 %v2426_v23, %v2420_v55  ;;  %v3552_v32 = vpack.c.bf16 %v2515_v24, %v2509_v45  ;;  %v2428_v36 = vpop.f32.mrb[23].mxu0  ;;  %v2517_v26 = vpop.f32.mrb[39].mxu1  ;;  %v2782_v55 = vld [vmem:[%s5033_s8 + $0xc0] sm:$0xff]  ;;  %v2783_v45 = vld [vmem:[%s5033_s8 + $0xc8] sm:$0xff]  ;;  %v2785_v23 = vld [vmem:[%s5033_s8 + $0xd8] sm:$0xff] }
 0x9d5   :  { %v3537_v17 = vpack.c.bf16 %v2428_v36, %v2422_v3  ;;  %v3549_v30 = vpack.c.bf16 %v2517_v26, %v2511_v13  ;;  %v2815_v3 = vld [vmem:[%s5033_s8 + $0x1c8] sm:$0xff]  ;;  %v3569_v13 = vpack.c.bf16 %v2765_v58, %v2764_v50  ;;  %v3571_v46 = vpack.c.bf16 %v2783_v45, %v2782_v55  ;;  %v2816_v24 = vld [vmem:[%s5033_s8 + $0x1d0] sm:$0xff]  ;;  %v2769_v26 = vld [vmem:[%s5033_s8 + $0x58] sm:$0xff] }
 0x9d6   :  { %v3603_v28 = vpack.c.bf16 %v2815_v3, %v2814_v47  ;;  %v2768_v36 = vld [vmem:[%s5033_s8 + $0x50] sm:$0xff]  ;;  %v3575_v41 = vpack.c.bf16 %v2785_v23, %v2784_v10  ;;  %v3607_v18 = vpack.c.bf16 %v2817_v15, %v2816_v24 }
 0x9d7   :  { %3539 = vmatprep.subr.msk.bf16.mxu0 %vm5102_vm6, %v3537_v17  ;;  %3551 = vmatprep.subr.msk.bf16.mxu1 %vm3550_vm5, %v3549_v30  ;;  %v2800_v17 = vld [vmem:[%s5033_s8 + $0x150] sm:$0xff]  ;;  %v2801_v30 = vld [vmem:[%s5033_s8 + $0x158] sm:$0xff]  ;;  %v3577_v8 = vpack.c.bf16 %v2769_v26, %v2768_v36 }
 0x9d8   :  { %3542 = vmatpush1.bf16.msk.msra.mxu0 %vm3541_vm8, %v3540_v59  ;;  %3554 = vmatpush1.bf16.msk.msra.mxu1 %vm3553_vm11, %v3552_v32  ;;  %v3573_v59 = vpack.c.bf16 %v2767_v25, %v2766_v19  ;;  %v3605_v32 = vpack.c.bf16 %v2799_v9, %v2798_v0  ;;  %v3609_v33 = vpack.c.bf16 %v2801_v30, %v2800_v17 }
 0x9d9   :  { %3556 = vmatprep.subr.bf16.mxu0 %v3555_v48  ;;  %3588 = vmatprep.subr.bf16.mxu1 %v3587_v51  ;;  %v2786_v48 = vld [vmem:[%s5033_s8 + $0xe0] sm:$0xff]  ;;  %v2787_v51 = vld [vmem:[%s5033_s8 + $0xe8] sm:$0xff] }
 0x9db   :  { %3117 = vmatmul.mubr.msk.f32.vlgmr.msra.gmra.mrb[24].mxu0 %vm5103_vm13, %v2612_v34  ;;  %3126 = vmatmul.mubr.msk.f32.vlgmr.msra.gmra.mrb[40].mxu1 %vm5104_vm9, %v2612_v34  ;;  %v2771_v34 = vld [vmem:[%s5033_s8 + $0x68] sm:$0xff] }
 0x9dc   :  { %3558 = vmatpush3.bf16.msra.mxu0 %v3557_v6  ;;  %3590 = vmatpush3.bf16.msra.mxu1 %v3589_v21  ;;  %v3579_v6 = vpack.c.bf16 %v2787_v51, %v2786_v48  ;;  %v3611_v21 = vpack.c.bf16 %v2819_v40, %v2818_v56  ;;  %v3581_v42 = vpack.c.bf16 %v2771_v34, %v2770_v38 }
 0x9dd   :  { %3560 = vmatprep.subr.bf16.mxu0 %v3559_v1  ;;  %3592 = vmatprep.subr.bf16.mxu1 %v3591_v63  ;;  %v2788_v1 = vld [vmem:[%s5033_s8 + $0xf0] sm:$0xff]  ;;  %v2789_v63 = vld [vmem:[%s5033_s8 + $0xf8] sm:$0xff] }
 0x9de   :  { %v3583_v7 = vpack.c.bf16 %v2789_v63, %v2788_v1 }
 0x9e0   :  { %3562 = vmatpush3.bf16.msra.mxu0 %v3561_v16  ;;  %3594 = vmatpush3.bf16.msra.mxu1 %v3593_v49  ;;  %v2772_v16 = vld [vmem:[%s5033_s8 + $0x70] sm:$0xff]  ;;  %v2773_v49 = vld [vmem:[%s5033_s8 + $0x78] sm:$0xff] }
 0x9e1   :  { %3564 = vmatprep.subr.bf16.mxu0 %v3563_v20  ;;  %3596 = vmatprep.subr.bf16.mxu1 %v3595_v29  ;;  %v3585_v35 = vpack.c.bf16 %v2773_v49, %v2772_v16  ;;  %v2805_v20 = vld [vmem:[%s5033_s8 + $0x178] sm:$0xff]  ;;  %s3716_s8 = scalar_lea.vmem %s2970_s26, 32 }
 0x9e2   :  { %v3617_v29 = vpack.c.bf16 %v2805_v20, %v2804_v2  ;;  %p3717_p0 = scmp.ne.s32.totalorder %s2970_s26, %s3716_s8  ;;  %p3722_p2 = scmp.lt.s32.totalorder %s3716_s8, %s3716_s8 }
 0x9e4   :  { %3566 = vmatpush3.bf16.msra.mxu0 %v3565_v37  ;;  %3598 = vmatpush3.bf16.msra.mxu1 %v3597_v60  ;;  %p3723_p3 = por %p3722_p2, %p3721_p1 }
 0x9e5   :  { %3568 = vmatprep.subr.bf16.mxu0 %v3567_v53  ;;  %3600 = vmatprep.subr.bf16.mxu1 %v3599_v11 }
 0x9e6   :  { %p3724_p4 = pnand %p3723_p3, %p3717_p0 }
 0x9e8   :  { %3570 = vmatpush3.bf16.msra.mxu0 %v3569_v13  ;;  %3602 = vmatpush3.bf16.msra.mxu1 %v3601_v54 }
 0x9e9   :  { %3572 = vmatprep.subr.bf16.mxu0 %v3571_v46  ;;  %3604 = vmatprep.subr.bf16.mxu1 %v3603_v28 }
 0x9ec   :  { %3574 = vmatpush3.bf16.msra.mxu0 %v3573_v59  ;;  %3606 = vmatpush3.bf16.msra.mxu1 %v3605_v32 }
 0x9ed   :  { %3576 = vmatprep.subr.bf16.mxu0 %v3575_v41  ;;  %3608 = vmatprep.subr.bf16.mxu1 %v3607_v18 }
 0x9f0   :  { %3578 = vmatpush3.bf16.msra.mxu0 %v3577_v8  ;;  %3610 = vmatpush3.bf16.msra.mxu1 %v3609_v33 }
 0x9f1   :  { %3580 = vmatprep.subr.bf16.mxu0 %v3579_v6  ;;  %3612 = vmatprep.subr.bf16.mxu1 %v3611_v21 }
 0x9f4   :  { %3582 = vmatpush3.bf16.msra.mxu0 %v3581_v42  ;;  %3614 = vmatpush3.bf16.msra.mxu1 %v3613_v22 }
 0x9f5   :  { %3584 = vmatprep.subr.bf16.mxu0 %v3583_v7  ;;  %3616 = vmatprep.subr.bf16.mxu1 %v3615_v14 }
 0x9f8   :  { %3586 = vmatpush3.bf16.msra.mxu0 %v3585_v35  ;;  %3618 = vmatpush3.bf16.msra.mxu1 %v3617_v29 }
 0xaae   :  { %v2682_v57 = vpop.f32.mrb[24].mxu0  ;;  %v2753_v62 = vpop.f32.mrb[40].mxu1 }
 0xaaf   :  { %v2684_v27 = vpop.f32.mrb[25].mxu0  ;;  %v2755_v44 = vpop.f32.mrb[41].mxu1 }
 0xab0   :  { %2886 = vmatprep.mubr.f32.mxu0 %v2684_v27  ;;  %2956 = vmatprep.mubr.f32.mxu1 %v2755_v44 }
 0xab1   :  { %2887 = vmatmul.mubr.f32.vlgmr.msra.gmra.mrb[26].mxu0 %v2682_v57  ;;  %2957 = vmatmul.mubr.f32.vlgmr.msra.gmra.mrb[42].mxu1 %v2753_v62 }
 0xb84   :  { %v3245_v31 = vpop.f32.mrb[26].mxu0  ;;  %v3280_v39 = vpop.f32.mrb[42].mxu1 }
 0xb85   :  { %v3246_v37 = vpop.f32.mrb[27].mxu0  ;;  %v3281_v60 = vpop.f32.mrb[43].mxu1 }
 0xb86   :  { %v3247_v50 = vadd.f32 %v3246_v37, %v3245_v31  ;;  %v3282_v58 = vadd.f32 %v3281_v60, %v3280_v39 }
 0xb88   :  { %v2959_v53 = vadd.f32 %v3282_v58, %v3247_v50 }
 0xb8a   :  { %2962 = vst [vmem:[#allocation2] sm:$0x3] %v2959_v53 }
 0xb8b   :  { %3727 = shalt.err (!%p3724_p4)
}
 0xb8c   :  { %s3728_s6 = scalar_lea.hbm %s5034_s9, 32 }
 0xb8d   :  { %p3729_p5 = scmp.ne.s32.totalorder %s5034_s9, %s3728_s6  ;;  %p3732_p6 = scmp.lt.u32.totalorder %s3728_s6, %s5034_s9 }
 0xb8f   :  { %p3734_p7 = pnand %p3732_p6, %p3729_p5 }
 0xb91   :  { %3737 = shalt.err (!%p3734_p7)
}
 0xb92   :  { %2972 = dma.vmem_to_hbm [thread:$0]  %s2970_s26, 32, %s5034_s9, [#allocation3]  }
 0xb93   :  { %3738 = dma.done.wait [#allocation3], 32  }
 0xb94   :  { %3739 = vsyncadd [#allocation3], 4294967264 }
 0xb95   :  { %2976 = vsyncpa [#allocation3], 1 }

</bundles_post_ra>
